<compile_context>
chip_gen: v7x
topology: tpu7x:2x2x1
jax: 0.10.0
libtpu: 0.0.40
codegen_flags: <defaults>
</compile_context>

<pallas_src>
import functools

import jax
import jax.numpy as jnp
from jax.experimental import pallas as pl
from jax.experimental.pallas import tpu as pltpu


# ----------------------------------------------------------------------------
# fused kernel: single invocation, statically unrolled time loop
# ----------------------------------------------------------------------------
def _fused_gcnrnn_kernel(T, num_layers, H, *refs):
    # refs layout (all VMEM-resident, loaded once):
    #   x_ref (T, B*N, Fin)   adj_bd_ref (B*N, B*N)   pool_ref (B, B*N)
    #   gcn_w (Fin, Fg)       gcn_b (1, Fg)
    #   [w_cat (in+H, 4H), b (1, 4H)] * num_layers
    #   lin_w (H, C)          lin_b (1, C)
    #   out_ref (B, T*C)
    idx = 0
    x_ref, adj_bd_ref, pool_ref, gcn_w_ref, gcn_b_ref = refs[idx:idx + 5]
    idx += 5
    lstm_refs = []
    for _ in range(num_layers):
        lstm_refs.append(refs[idx:idx + 2])
        idx += 2
    lin_w_ref, lin_b_ref = refs[idx:idx + 2]
    idx += 2
    out_ref = refs[idx]

    # Time-invariant operands: load once, reuse across all T steps / layers.
    adj_bd = adj_bd_ref[...]                      # (B*N, B*N)
    pool = pool_ref[...]                          # (B, B*N)  mean over nodes per graph
    gcn_w = gcn_w_ref[...]
    gcn_b = gcn_b_ref[...]
    w_cats = [w_ref[...] for (w_ref, _) in lstm_refs]     # (in+H, 4H)
    biases = [b_ref[...] for (_, b_ref) in lstm_refs]     # (1, 4H)
    lin_w = lin_w_ref[...]
    lin_b = lin_b_ref[...]

    B = pool.shape[0]

    # Hoisted lane mask selecting the g-gate columns of the (B, 4H) gates vreg.
    lane = jax.lax.broadcasted_iota(jnp.int32, (B, 4 * H), 1)
    is_g = jnp.logical_and(lane >= 2 * H, lane < 3 * H)

    # Recurrent state as plain values (single kernel body, no scratch needed).
    h_states = [jnp.zeros((B, H), jnp.float32) for _ in range(num_layers)]
    c_states = [jnp.zeros((B, H), jnp.float32) for _ in range(num_layers)]

    outs = []
    for t in range(T):                            # statically unrolled: T is small
        # --- GCN stand-in: mean_n( relu(adj @ x @ W + b) ) as flat 2-D dots -----
        x_t = x_ref[t]                            # (B*N, Fin)
        agg = jnp.dot(adj_bd, x_t, preferred_element_type=jnp.float32)
        g = jnp.dot(agg, gcn_w, preferred_element_type=jnp.float32) + gcn_b
        h_t = jnp.dot(pool, jnp.maximum(g, 0.0),
                      preferred_element_type=jnp.float32)          # (B, Fg)

        # --- stacked LSTM cells (PyTorch gate order i, f, g, o) ------------------
        for l in range(num_layers):
            inp = jnp.concatenate([h_t, h_states[l]], axis=1)      # (B, in+H)
            gates = jnp.dot(inp, w_cats[l],
                            preferred_element_type=jnp.float32) + biases[l]  # (B, 4H)
            # single EUP pass: sigmoid(x) = 0.5 * tanh(x/2) + 0.5
            th = jnp.tanh(jnp.where(is_g, gates, 0.5 * gates))
            acts = jnp.where(is_g, th, 0.5 * th + 0.5)
            i_g = acts[:, 0 * H:1 * H]
            f_g = acts[:, 1 * H:2 * H]
            g_g = acts[:, 2 * H:3 * H]
            o_g = acts[:, 3 * H:4 * H]
            c_new = f_g * c_states[l] + i_g * g_g
            h_new = o_g * jnp.tanh(c_new)
            c_states[l] = c_new
            h_states[l] = h_new
            h_t = h_new

        # --- head: linear + log_softmax(dim=1) ----------------------------------
        logits = jnp.dot(h_t, lin_w, preferred_element_type=jnp.float32) + lin_b
        m = jnp.max(logits, axis=1, keepdims=True)
        lse = jnp.log(jnp.sum(jnp.exp(logits - m), axis=1, keepdims=True)) + m
        outs.append(logits - lse)                                  # (B, C)

    # One lane-dense HBM writeback: (B, T*C), time-major along the lane axis.
    out_ref[...] = jnp.concatenate(outs, axis=1)


# ----------------------------------------------------------------------------
# module: parameters + fused sequence forward
# ----------------------------------------------------------------------------
class GCNRNNPallas:
    def __init__(self, key, n_node_features, gcn_n_output, layer_size, num_layers,
                 nclasses=1):
        self.n_node_features = n_node_features
        self.gcn_n_output = gcn_n_output
        self.layer_size = layer_size
        self.num_layers = num_layers
        self.nclasses = nclasses

        def uni(k, shape, scale):
            return jax.random.uniform(k, shape, jnp.float32, -scale, scale)

        keys = jax.random.split(key, 4 + 4 * num_layers)
        ki = iter(keys)

        # one-layer GCN stand-in: mean_n( relu(adj @ x @ W + b) )
        s = 1.0 / jnp.sqrt(n_node_features)
        self.gcn_w = uni(next(ki), (n_node_features, gcn_n_output), s)
        self.gcn_b = uni(next(ki), (1, gcn_n_output), s)

        # stacked LSTM cells; wih/whh pre-concatenated to one (in+H, 4H) matrix so the
        # kernel does a single fused matmul per layer per step
        hiddens = [gcn_n_output] + [layer_size] * num_layers
        self.lstm_fin = hiddens[:-1]
        self.lstm_params = []
        for fin, fout in zip(hiddens[:-1], hiddens[1:]):
            s = 1.0 / jnp.sqrt(fout)
            wih = uni(next(ki), (fin, 4 * fout), s)      # (in, 4H)
            whh = uni(next(ki), (fout, 4 * fout), s)     # (H, 4H)
            b = uni(next(ki), (1, 4 * fout), s) + uni(next(ki), (1, 4 * fout), s)
            self.lstm_params.append((jnp.concatenate([wih, whh], axis=0), b))

        # output linear layer
        s = 1.0 / jnp.sqrt(layer_size)
        self.lin_w = uni(next(ki), (layer_size, nclasses), s)
        self.lin_b = uni(next(ki), (1, nclasses), s)

        # TODO(synk): optionally store bf16 weights (f32 accumulation) on v6e/v7x once
        #             throughput-bound at larger sizes.

    def _build_call(self, T, B, N, Fin):
        H = self.layer_size
        C = self.nclasses
        L = self.num_layers

        n_inputs = 5 + 2 * L + 2
        vmem_spec = lambda: pl.BlockSpec(memory_space=pltpu.MemorySpace.VMEM)
        kernel = functools.partial(_fused_gcnrnn_kernel, T, L, H)

        return pl.pallas_call(
            kernel,
            out_shape=jax.ShapeDtypeStruct((B, T * C), jnp.float32),
            in_specs=[vmem_spec() for _ in range(n_inputs)],
            out_specs=vmem_spec(),
            compiler_params=pltpu.CompilerParams(
                vmem_limit_bytes=32 * 1024 * 1024,
            ),
        )

    def forward_sequence(self, xs, adj):
        """Equivalent to calling the torch GCNRNN.forward once per step with init=True
        at t=0 and export=True at t=T-1 (fresh zero state, outputs stacked).
        xs: (T, B, N, Fin), adj: (B, N, N) -> (B, T) if nclasses==1 else (B, T, C)."""
        T, B, N, Fin = xs.shape
        BN = B * N

        # Time-invariant GCN operands, built once on the host:
        eye_b = jnp.eye(B, dtype=jnp.float32)
        adj_bd = (eye_b[:, None, :, None] * adj[:, :, None, :]).reshape(BN, BN)
        pool = jnp.repeat(eye_b, N, axis=1) / N            # (B, B*N) mean-pool matrix
        x_flat = xs.reshape(T, BN, Fin)

        call = self._build_call(T, B, N, Fin)
        args = [x_flat, adj_bd, pool, self.gcn_w, self.gcn_b]
        for w_cat, b in self.lstm_params:
            args += [w_cat, b]
        args += [self.lin_w, self.lin_b]

        out = call(*args)                                  # (B, T*C), lane-dense
        out = out.reshape(B, T, self.nclasses)
        if self.nclasses == 1:
            out = jnp.squeeze(out, axis=2)                 # torch .squeeze(2)
        return out


# ----------------------------------------------------------------------------
# pure-JAX reference (same math) for a numerical sanity check
# ----------------------------------------------------------------------------
def _reference_forward(model, xs, adj):
    T, B = xs.shape[0], xs.shape[1]
    H = model.layer_size
    h_states = [jnp.zeros((B, H), jnp.float32) for _ in range(model.num_layers)]
    c_states = [jnp.zeros((B, H), jnp.float32) for _ in range(model.num_layers)]
    outs = []
    for t in range(T):
        agg = jnp.einsum("bnm,bmf->bnf", adj, xs[t])
        g = jnp.einsum("bnf,fo->bno", agg, model.gcn_w) + model.gcn_b
        h_t = jnp.mean(jax.nn.relu(g), axis=1)
        for l, (w_cat, b) in enumerate(model.lstm_params):
            fin = model.lstm_fin[l]
            gates = h_t @ w_cat[:fin] + h_states[l] @ w_cat[fin:] + b
            i = jax.nn.sigmoid(gates[:, 0 * H:1 * H])
            f = jax.nn.sigmoid(gates[:, 1 * H:2 * H])
            gg = jnp.tanh(gates[:, 2 * H:3 * H])
            o = jax.nn.sigmoid(gates[:, 3 * H:4 * H])
            c = f * c_states[l] + i * gg
            h = o * jnp.tanh(c)
            h_states[l], c_states[l] = h, c
            h_t = h
        logits = h_t @ model.lin_w + model.lin_b
        outs.append(jax.nn.log_softmax(logits, axis=1))
    return jnp.stack(outs, axis=1)                          # (B, T, C)


# ----------------------------------------------------------------------------
# demo
# ----------------------------------------------------------------------------
if __name__ == "__main__":
    B, N, F_IN = 2, 8, 4          # batch, graph nodes, node features
    GCN_OUT = 16                  # gcn_model.n_output
    LAYER_SIZE = 32               # 4H = 128 -> gates fill one full lane vreg
    NUM_LAYERS = 2
    T = 8                         # sequence length (number of forward() calls fused)

    root = jax.random.PRNGKey(0)
    k_model, k_model2, k_x, k_adj = jax.random.split(root, 4)

    # deterministic per-step node features and a row-normalized adjacency
    xs = jax.random.normal(k_x, (T, B, N, F_IN), jnp.float32)
    a = (jax.random.uniform(k_adj, (B, N, N)) > 0.5).astype(jnp.float32)
    a = a + jnp.eye(N, dtype=jnp.float32)[None]
    adj = a / jnp.sum(a, axis=-1, keepdims=True)

    # --- main model (module default nclasses=1 -> exported shape (B, T)) -----
    model = GCNRNNPallas(k_model, F_IN, GCN_OUT, LAYER_SIZE, NUM_LAYERS, nclasses=1)
    out = jax.block_until_ready(model.forward_sequence(xs, adj))
    assert out.shape == (B, T), out.shape
    assert bool(jnp.all(jnp.isfinite(out)))

    # --- numerical check vs pure-JAX reference (nclasses>1 so log_softmax != 0)
    model4 = GCNRNNPallas(k_model2, F_IN, GCN_OUT, LAYER_SIZE, NUM_LAYERS, nclasses=4)
    got = jax.block_until_ready(model4.forward_sequence(xs, adj))    # (B, T, 4)
    ref = _reference_forward(model4, xs, adj)
    assert got.shape == ref.shape, (got.shape, ref.shape)
    err = float(jnp.max(jnp.abs(got - ref)))
    assert err < 1e-4, err

    print("KERNEL_OK")
</pallas_src>

<mosaic_0001>
module attributes {stable_mosaic.version = 11 : i64} {
  func.func @_fused_gcnrnn_kernel(%arg0: memref<8x16x4xf32, #tpu.memory_space<vmem>>, %arg1: memref<16x16xf32, #tpu.memory_space<vmem>>, %arg2: memref<2x16xf32, #tpu.memory_space<vmem>>, %arg3: memref<4x16xf32, #tpu.memory_space<vmem>>, %arg4: memref<1x16xf32, #tpu.memory_space<vmem>>, %arg5: memref<48x128xf32, #tpu.memory_space<vmem>>, %arg6: memref<1x128xf32, #tpu.memory_space<vmem>>, %arg7: memref<64x128xf32, #tpu.memory_space<vmem>>, %arg8: memref<1x128xf32, #tpu.memory_space<vmem>>, %arg9: memref<32x1xf32, #tpu.memory_space<vmem>>, %arg10: memref<1x1xf32, #tpu.memory_space<vmem>>, %arg11: memref<2x8xf32, #tpu.memory_space<vmem>>) attributes {dimension_semantics = [], scalar_prefetch = 0 : i64, scratch_operands = 0 : i64, tpu.core_type = #tpu.core_type<tc>} {
    %c0 = arith.constant 0 : index
    %c0_0 = arith.constant 0 : index
    %0 = vector.load %arg1[%c0, %c0_0] : memref<16x16xf32, #tpu.memory_space<vmem>>, vector<16x16xf32>
    %c0_1 = arith.constant 0 : index
    %c0_2 = arith.constant 0 : index
    %1 = vector.load %arg2[%c0_1, %c0_2] : memref<2x16xf32, #tpu.memory_space<vmem>>, vector<2x16xf32>
    %c0_3 = arith.constant 0 : index
    %c0_4 = arith.constant 0 : index
    %2 = vector.load %arg3[%c0_3, %c0_4] : memref<4x16xf32, #tpu.memory_space<vmem>>, vector<4x16xf32>
    %c0_5 = arith.constant 0 : index
    %c0_6 = arith.constant 0 : index
    %3 = vector.load %arg4[%c0_5, %c0_6] : memref<1x16xf32, #tpu.memory_space<vmem>>, vector<1x16xf32>
    %c0_7 = arith.constant 0 : index
    %c0_8 = arith.constant 0 : index
    %4 = vector.load %arg5[%c0_7, %c0_8] : memref<48x128xf32, #tpu.memory_space<vmem>>, vector<48x128xf32>
    %c0_9 = arith.constant 0 : index
    %c0_10 = arith.constant 0 : index
    %5 = vector.load %arg7[%c0_9, %c0_10] : memref<64x128xf32, #tpu.memory_space<vmem>>, vector<64x128xf32>
    %c0_11 = arith.constant 0 : index
    %c0_12 = arith.constant 0 : index
    %6 = vector.load %arg6[%c0_11, %c0_12] : memref<1x128xf32, #tpu.memory_space<vmem>>, vector<1x128xf32>
    %c0_13 = arith.constant 0 : index
    %c0_14 = arith.constant 0 : index
    %7 = vector.load %arg8[%c0_13, %c0_14] : memref<1x128xf32, #tpu.memory_space<vmem>>, vector<1x128xf32>
    %c0_15 = arith.constant 0 : index
    %c0_16 = arith.constant 0 : index
    %8 = vector.load %arg9[%c0_15, %c0_16] : memref<32x1xf32, #tpu.memory_space<vmem>>, vector<32x1xf32>
    %c0_17 = arith.constant 0 : index
    %c0_18 = arith.constant 0 : index
    %9 = vector.load %arg10[%c0_17, %c0_18] : memref<1x1xf32, #tpu.memory_space<vmem>>, vector<1x1xf32>
    %10 = tpu.iota {dimensions = array<i32: 1>} : vector<2x128xi32>
    %c64_i32 = arith.constant 64 : i32
    %11 = vector.broadcast %c64_i32 : i32 to vector<2x128xi32>
    %12 = arith.cmpi sge, %10, %11 : vector<2x128xi32>
    %c96_i32 = arith.constant 96 : i32
    %13 = vector.broadcast %c96_i32 : i32 to vector<2x128xi32>
    %14 = arith.cmpi slt, %10, %13 : vector<2x128xi32>
    %15 = arith.andi %12, %14 : vector<2x128xi1>
    %cst = arith.constant 0.000000e+00 : f32
    %16 = vector.broadcast %cst : f32 to vector<2x32xf32>
    %cst_19 = arith.constant 0.000000e+00 : f32
    %17 = vector.broadcast %cst_19 : f32 to vector<2x32xf32>
    %cst_20 = arith.constant 0.000000e+00 : f32
    %18 = vector.broadcast %cst_20 : f32 to vector<2x32xf32>
    %cst_21 = arith.constant 0.000000e+00 : f32
    %19 = vector.broadcast %cst_21 : f32 to vector<2x32xf32>
    %c0_22 = arith.constant 0 : index
    %c0_23 = arith.constant 0 : index
    %c0_24 = arith.constant 0 : index
    %20 = vector.load %arg0[%c0_22, %c0_23, %c0_24] : memref<8x16x4xf32, #tpu.memory_space<vmem>>, vector<1x16x4xf32>
    %21 = vector.shape_cast %20 : vector<1x16x4xf32> to vector<16x4xf32>
    %cst_25 = arith.constant dense<0.000000e+00> : vector<16x4xf32>
    %22 = tpu.matmul %0, %21, %cst_25 {dimension_numbers = #tpu.dot_dimension_numbers<[1], [0], [0], [1], [0, 0, 1, 1], [], []>} : vector<16x16xf32>, vector<16x4xf32>, vector<16x4xf32> -> vector<16x4xf32>
    %cst_26 = arith.constant dense<0.000000e+00> : vector<16x16xf32>
    %23 = tpu.matmul %22, %2, %cst_26 {dimension_numbers = #tpu.dot_dimension_numbers<[1], [0], [0], [1], [0, 0, 1, 1], [], []>} : vector<16x4xf32>, vector<4x16xf32>, vector<16x16xf32> -> vector<16x16xf32>
    %24 = vector.broadcast %3 : vector<1x16xf32> to vector<16x16xf32>
    %25 = arith.addf %23, %24 : vector<16x16xf32>
    %cst_27 = arith.constant 0.000000e+00 : f32
    %26 = vector.broadcast %cst_27 : f32 to vector<16x16xf32>
    %27 = arith.maximumf %25, %26 : vector<16x16xf32>
    %cst_28 = arith.constant dense<0.000000e+00> : vector<2x16xf32>
    %28 = tpu.matmul %1, %27, %cst_28 {dimension_numbers = #tpu.dot_dimension_numbers<[1], [0], [0], [1], [0, 0, 1, 1], [], []>} : vector<2x16xf32>, vector<16x16xf32>, vector<2x16xf32> -> vector<2x16xf32>
    %29 = tpu.concatenate %28, %16 in 1 : vector<2x16xf32>, vector<2x32xf32> -> vector<2x48xf32>
    %cst_29 = arith.constant dense<0.000000e+00> : vector<2x128xf32>
    %30 = tpu.matmul %29, %4, %cst_29 {dimension_numbers = #tpu.dot_dimension_numbers<[1], [0], [0], [1], [0, 0, 1, 1], [], []>} : vector<2x48xf32>, vector<48x128xf32>, vector<2x128xf32> -> vector<2x128xf32>
    %31 = vector.broadcast %6 : vector<1x128xf32> to vector<2x128xf32>
    %32 = arith.addf %30, %31 : vector<2x128xf32>
    %cst_30 = arith.constant 5.000000e-01 : f32
    %33 = vector.broadcast %cst_30 : f32 to vector<2x128xf32>
    %34 = arith.mulf %33, %32 : vector<2x128xf32>
    %35 = arith.select %15, %32, %34 : vector<2x128xi1>, vector<2x128xf32>
    %36 = math.tanh %35 : vector<2x128xf32>
    %cst_31 = arith.constant 5.000000e-01 : f32
    %37 = vector.broadcast %cst_31 : f32 to vector<2x128xf32>
    %38 = arith.mulf %37, %36 : vector<2x128xf32>
    %cst_32 = arith.constant 5.000000e-01 : f32
    %39 = vector.broadcast %cst_32 : f32 to vector<2x128xf32>
    %40 = arith.addf %38, %39 : vector<2x128xf32>
    %41 = arith.select %15, %36, %40 : vector<2x128xi1>, vector<2x128xf32>
    %42 = vector.extract_strided_slice %41 {offsets = [0, 0], sizes = [2, 32], strides = [1, 1]} : vector<2x128xf32> to vector<2x32xf32>
    %43 = vector.extract_strided_slice %41 {offsets = [0, 32], sizes = [2, 32], strides = [1, 1]} : vector<2x128xf32> to vector<2x32xf32>
    %44 = vector.extract_strided_slice %41 {offsets = [0, 64], sizes = [2, 32], strides = [1, 1]} : vector<2x128xf32> to vector<2x32xf32>
    %45 = vector.extract_strided_slice %41 {offsets = [0, 96], sizes = [2, 32], strides = [1, 1]} : vector<2x128xf32> to vector<2x32xf32>
    %46 = arith.mulf %43, %18 : vector<2x32xf32>
    %47 = arith.mulf %42, %44 : vector<2x32xf32>
    %48 = arith.addf %46, %47 : vector<2x32xf32>
    %49 = math.tanh %48 : vector<2x32xf32>
    %50 = arith.mulf %45, %49 : vector<2x32xf32>
    %51 = tpu.concatenate %50, %17 in 1 : vector<2x32xf32>, vector<2x32xf32> -> vector<2x64xf32>
    %cst_33 = arith.constant dense<0.000000e+00> : vector<2x128xf32>
    %52 = tpu.matmul %51, %5, %cst_33 {dimension_numbers = #tpu.dot_dimension_numbers<[1], [0], [0], [1], [0, 0, 1, 1], [], []>} : vector<2x64xf32>, vector<64x128xf32>, vector<2x128xf32> -> vector<2x128xf32>
    %53 = vector.broadcast %7 : vector<1x128xf32> to vector<2x128xf32>
    %54 = arith.addf %52, %53 : vector<2x128xf32>
    %cst_34 = arith.constant 5.000000e-01 : f32
    %55 = vector.broadcast %cst_34 : f32 to vector<2x128xf32>
    %56 = arith.mulf %55, %54 : vector<2x128xf32>
    %57 = arith.select %15, %54, %56 : vector<2x128xi1>, vector<2x128xf32>
    %58 = math.tanh %57 : vector<2x128xf32>
    %cst_35 = arith.constant 5.000000e-01 : f32
    %59 = vector.broadcast %cst_35 : f32 to vector<2x128xf32>
    %60 = arith.mulf %59, %58 : vector<2x128xf32>
    %cst_36 = arith.constant 5.000000e-01 : f32
    %61 = vector.broadcast %cst_36 : f32 to vector<2x128xf32>
    %62 = arith.addf %60, %61 : vector<2x128xf32>
    %63 = arith.select %15, %58, %62 : vector<2x128xi1>, vector<2x128xf32>
    %64 = vector.extract_strided_slice %63 {offsets = [0, 0], sizes = [2, 32], strides = [1, 1]} : vector<2x128xf32> to vector<2x32xf32>
    %65 = vector.extract_strided_slice %63 {offsets = [0, 32], sizes = [2, 32], strides = [1, 1]} : vector<2x128xf32> to vector<2x32xf32>
    %66 = vector.extract_strided_slice %63 {offsets = [0, 64], sizes = [2, 32], strides = [1, 1]} : vector<2x128xf32> to vector<2x32xf32>
    %67 = vector.extract_strided_slice %63 {offsets = [0, 96], sizes = [2, 32], strides = [1, 1]} : vector<2x128xf32> to vector<2x32xf32>
    %68 = arith.mulf %65, %19 : vector<2x32xf32>
    %69 = arith.mulf %64, %66 : vector<2x32xf32>
    %70 = arith.addf %68, %69 : vector<2x32xf32>
    %71 = math.tanh %70 : vector<2x32xf32>
    %72 = arith.mulf %67, %71 : vector<2x32xf32>
    %cst_37 = arith.constant dense<0.000000e+00> : vector<2x1xf32>
    %73 = tpu.matmul %72, %8, %cst_37 {dimension_numbers = #tpu.dot_dimension_numbers<[1], [0], [0], [1], [0, 0, 1, 1], [], []>} : vector<2x32xf32>, vector<32x1xf32>, vector<2x1xf32> -> vector<2x1xf32>
    %74 = vector.broadcast %9 : vector<1x1xf32> to vector<2x1xf32>
    %75 = arith.addf %73, %74 : vector<2x1xf32>
    %cst_38 = arith.constant dense<0xFF800000> : vector<2xf32>
    %76 = vector.multi_reduction <maximumf>, %75, %cst_38 [1] : vector<2x1xf32> to vector<2xf32>
    %77 = vector.shape_cast %76 : vector<2xf32> to vector<2x1xf32>
    %78 = arith.subf %75, %77 : vector<2x1xf32>
    %79 = math.exp %78 : vector<2x1xf32>
    %cst_39 = arith.constant dense<0.000000e+00> : vector<2xf32>
    %80 = vector.multi_reduction <add>, %79, %cst_39 [1] : vector<2x1xf32> to vector<2xf32>
    %81 = vector.shape_cast %80 : vector<2xf32> to vector<2x1xf32>
    %82 = math.log %81 : vector<2x1xf32>
    %83 = arith.addf %82, %77 : vector<2x1xf32>
    %84 = arith.subf %75, %83 : vector<2x1xf32>
    %c1 = arith.constant 1 : index
    %c0_40 = arith.constant 0 : index
    %c0_41 = arith.constant 0 : index
    %85 = vector.load %arg0[%c1, %c0_40, %c0_41] : memref<8x16x4xf32, #tpu.memory_space<vmem>>, vector<1x16x4xf32>
    %86 = vector.shape_cast %85 : vector<1x16x4xf32> to vector<16x4xf32>
    %cst_42 = arith.constant dense<0.000000e+00> : vector<16x4xf32>
    %87 = tpu.matmul %0, %86, %cst_42 {dimension_numbers = #tpu.dot_dimension_numbers<[1], [0], [0], [1], [0, 0, 1, 1], [], []>} : vector<16x16xf32>, vector<16x4xf32>, vector<16x4xf32> -> vector<16x4xf32>
    %cst_43 = arith.constant dense<0.000000e+00> : vector<16x16xf32>
    %88 = tpu.matmul %87, %2, %cst_43 {dimension_numbers = #tpu.dot_dimension_numbers<[1], [0], [0], [1], [0, 0, 1, 1], [], []>} : vector<16x4xf32>, vector<4x16xf32>, vector<16x16xf32> -> vector<16x16xf32>
    %89 = vector.broadcast %3 : vector<1x16xf32> to vector<16x16xf32>
    %90 = arith.addf %88, %89 : vector<16x16xf32>
    %cst_44 = arith.constant 0.000000e+00 : f32
    %91 = vector.broadcast %cst_44 : f32 to vector<16x16xf32>
    %92 = arith.maximumf %90, %91 : vector<16x16xf32>
    %cst_45 = arith.constant dense<0.000000e+00> : vector<2x16xf32>
    %93 = tpu.matmul %1, %92, %cst_45 {dimension_numbers = #tpu.dot_dimension_numbers<[1], [0], [0], [1], [0, 0, 1, 1], [], []>} : vector<2x16xf32>, vector<16x16xf32>, vector<2x16xf32> -> vector<2x16xf32>
    %94 = tpu.concatenate %93, %50 in 1 : vector<2x16xf32>, vector<2x32xf32> -> vector<2x48xf32>
    %cst_46 = arith.constant dense<0.000000e+00> : vector<2x128xf32>
    %95 = tpu.matmul %94, %4, %cst_46 {dimension_numbers = #tpu.dot_dimension_numbers<[1], [0], [0], [1], [0, 0, 1, 1], [], []>} : vector<2x48xf32>, vector<48x128xf32>, vector<2x128xf32> -> vector<2x128xf32>
    %96 = vector.broadcast %6 : vector<1x128xf32> to vector<2x128xf32>
    %97 = arith.addf %95, %96 : vector<2x128xf32>
    %cst_47 = arith.constant 5.000000e-01 : f32
    %98 = vector.broadcast %cst_47 : f32 to vector<2x128xf32>
    %99 = arith.mulf %98, %97 : vector<2x128xf32>
    %100 = arith.select %15, %97, %99 : vector<2x128xi1>, vector<2x128xf32>
    %101 = math.tanh %100 : vector<2x128xf32>
    %cst_48 = arith.constant 5.000000e-01 : f32
    %102 = vector.broadcast %cst_48 : f32 to vector<2x128xf32>
    %103 = arith.mulf %102, %101 : vector<2x128xf32>
    %cst_49 = arith.constant 5.000000e-01 : f32
    %104 = vector.broadcast %cst_49 : f32 to vector<2x128xf32>
    %105 = arith.addf %103, %104 : vector<2x128xf32>
    %106 = arith.select %15, %101, %105 : vector<2x128xi1>, vector<2x128xf32>
    %107 = vector.extract_strided_slice %106 {offsets = [0, 0], sizes = [2, 32], strides = [1, 1]} : vector<2x128xf32> to vector<2x32xf32>
    %108 = vector.extract_strided_slice %106 {offsets = [0, 32], sizes = [2, 32], strides = [1, 1]} : vector<2x128xf32> to vector<2x32xf32>
    %109 = vector.extract_strided_slice %106 {offsets = [0, 64], sizes = [2, 32], strides = [1, 1]} : vector<2x128xf32> to vector<2x32xf32>
    %110 = vector.extract_strided_slice %106 {offsets = [0, 96], sizes = [2, 32], strides = [1, 1]} : vector<2x128xf32> to vector<2x32xf32>
    %111 = arith.mulf %108, %48 : vector<2x32xf32>
    %112 = arith.mulf %107, %109 : vector<2x32xf32>
    %113 = arith.addf %111, %112 : vector<2x32xf32>
    %114 = math.tanh %113 : vector<2x32xf32>
    %115 = arith.mulf %110, %114 : vector<2x32xf32>
    %116 = tpu.concatenate %115, %72 in 1 : vector<2x32xf32>, vector<2x32xf32> -> vector<2x64xf32>
    %cst_50 = arith.constant dense<0.000000e+00> : vector<2x128xf32>
    %117 = tpu.matmul %116, %5, %cst_50 {dimension_numbers = #tpu.dot_dimension_numbers<[1], [0], [0], [1], [0, 0, 1, 1], [], []>} : vector<2x64xf32>, vector<64x128xf32>, vector<2x128xf32> -> vector<2x128xf32>
    %118 = vector.broadcast %7 : vector<1x128xf32> to vector<2x128xf32>
    %119 = arith.addf %117, %118 : vector<2x128xf32>
    %cst_51 = arith.constant 5.000000e-01 : f32
    %120 = vector.broadcast %cst_51 : f32 to vector<2x128xf32>
    %121 = arith.mulf %120, %119 : vector<2x128xf32>
    %122 = arith.select %15, %119, %121 : vector<2x128xi1>, vector<2x128xf32>
    %123 = math.tanh %122 : vector<2x128xf32>
    %cst_52 = arith.constant 5.000000e-01 : f32
    %124 = vector.broadcast %cst_52 : f32 to vector<2x128xf32>
    %125 = arith.mulf %124, %123 : vector<2x128xf32>
    %cst_53 = arith.constant 5.000000e-01 : f32
    %126 = vector.broadcast %cst_53 : f32 to vector<2x128xf32>
    %127 = arith.addf %125, %126 : vector<2x128xf32>
    %128 = arith.select %15, %123, %127 : vector<2x128xi1>, vector<2x128xf32>
    %129 = vector.extract_strided_slice %128 {offsets = [0, 0], sizes = [2, 32], strides = [1, 1]} : vector<2x128xf32> to vector<2x32xf32>
    %130 = vector.extract_strided_slice %128 {offsets = [0, 32], sizes = [2, 32], strides = [1, 1]} : vector<2x128xf32> to vector<2x32xf32>
    %131 = vector.extract_strided_slice %128 {offsets = [0, 64], sizes = [2, 32], strides = [1, 1]} : vector<2x128xf32> to vector<2x32xf32>
    %132 = vector.extract_strided_slice %128 {offsets = [0, 96], sizes = [2, 32], strides = [1, 1]} : vector<2x128xf32> to vector<2x32xf32>
    %133 = arith.mulf %130, %70 : vector<2x32xf32>
    %134 = arith.mulf %129, %131 : vector<2x32xf32>
    %135 = arith.addf %133, %134 : vector<2x32xf32>
    %136 = math.tanh %135 : vector<2x32xf32>
    %137 = arith.mulf %132, %136 : vector<2x32xf32>
    %cst_54 = arith.constant dense<0.000000e+00> : vector<2x1xf32>
    %138 = tpu.matmul %137, %8, %cst_54 {dimension_numbers = #tpu.dot_dimension_numbers<[1], [0], [0], [1], [0, 0, 1, 1], [], []>} : vector<2x32xf32>, vector<32x1xf32>, vector<2x1xf32> -> vector<2x1xf32>
    %139 = vector.broadcast %9 : vector<1x1xf32> to vector<2x1xf32>
    %140 = arith.addf %138, %139 : vector<2x1xf32>
    %cst_55 = arith.constant dense<0xFF800000> : vector<2xf32>
    %141 = vector.multi_reduction <maximumf>, %140, %cst_55 [1] : vector<2x1xf32> to vector<2xf32>
    %142 = vector.shape_cast %141 : vector<2xf32> to vector<2x1xf32>
    %143 = arith.subf %140, %142 : vector<2x1xf32>
    %144 = math.exp %143 : vector<2x1xf32>
    %cst_56 = arith.constant dense<0.000000e+00> : vector<2xf32>
    %145 = vector.multi_reduction <add>, %144, %cst_56 [1] : vector<2x1xf32> to vector<2xf32>
    %146 = vector.shape_cast %145 : vector<2xf32> to vector<2x1xf32>
    %147 = math.log %146 : vector<2x1xf32>
    %148 = arith.addf %147, %142 : vector<2x1xf32>
    %149 = arith.subf %140, %148 : vector<2x1xf32>
    %c2 = arith.constant 2 : index
    %c0_57 = arith.constant 0 : index
    %c0_58 = arith.constant 0 : index
    %150 = vector.load %arg0[%c2, %c0_57, %c0_58] : memref<8x16x4xf32, #tpu.memory_space<vmem>>, vector<1x16x4xf32>
    %151 = vector.shape_cast %150 : vector<1x16x4xf32> to vector<16x4xf32>
    %cst_59 = arith.constant dense<0.000000e+00> : vector<16x4xf32>
    %152 = tpu.matmul %0, %151, %cst_59 {dimension_numbers = #tpu.dot_dimension_numbers<[1], [0], [0], [1], [0, 0, 1, 1], [], []>} : vector<16x16xf32>, vector<16x4xf32>, vector<16x4xf32> -> vector<16x4xf32>
    %cst_60 = arith.constant dense<0.000000e+00> : vector<16x16xf32>
    %153 = tpu.matmul %152, %2, %cst_60 {dimension_numbers = #tpu.dot_dimension_numbers<[1], [0], [0], [1], [0, 0, 1, 1], [], []>} : vector<16x4xf32>, vector<4x16xf32>, vector<16x16xf32> -> vector<16x16xf32>
    %154 = vector.broadcast %3 : vector<1x16xf32> to vector<16x16xf32>
    %155 = arith.addf %153, %154 : vector<16x16xf32>
    %cst_61 = arith.constant 0.000000e+00 : f32
    %156 = vector.broadcast %cst_61 : f32 to vector<16x16xf32>
    %157 = arith.maximumf %155, %156 : vector<16x16xf32>
    %cst_62 = arith.constant dense<0.000000e+00> : vector<2x16xf32>
    %158 = tpu.matmul %1, %157, %cst_62 {dimension_numbers = #tpu.dot_dimension_numbers<[1], [0], [0], [1], [0, 0, 1, 1], [], []>} : vector<2x16xf32>, vector<16x16xf32>, vector<2x16xf32> -> vector<2x16xf32>
    %159 = tpu.concatenate %158, %115 in 1 : vector<2x16xf32>, vector<2x32xf32> -> vector<2x48xf32>
    %cst_63 = arith.constant dense<0.000000e+00> : vector<2x128xf32>
    %160 = tpu.matmul %159, %4, %cst_63 {dimension_numbers = #tpu.dot_dimension_numbers<[1], [0], [0], [1], [0, 0, 1, 1], [], []>} : vector<2x48xf32>, vector<48x128xf32>, vector<2x128xf32> -> vector<2x128xf32>
    %161 = vector.broadcast %6 : vector<1x128xf32> to vector<2x128xf32>
    %162 = arith.addf %160, %161 : vector<2x128xf32>
    %cst_64 = arith.constant 5.000000e-01 : f32
    %163 = vector.broadcast %cst_64 : f32 to vector<2x128xf32>
    %164 = arith.mulf %163, %162 : vector<2x128xf32>
    %165 = arith.select %15, %162, %164 : vector<2x128xi1>, vector<2x128xf32>
    %166 = math.tanh %165 : vector<2x128xf32>
    %cst_65 = arith.constant 5.000000e-01 : f32
    %167 = vector.broadcast %cst_65 : f32 to vector<2x128xf32>
    %168 = arith.mulf %167, %166 : vector<2x128xf32>
    %cst_66 = arith.constant 5.000000e-01 : f32
    %169 = vector.broadcast %cst_66 : f32 to vector<2x128xf32>
    %170 = arith.addf %168, %169 : vector<2x128xf32>
    %171 = arith.select %15, %166, %170 : vector<2x128xi1>, vector<2x128xf32>
    %172 = vector.extract_strided_slice %171 {offsets = [0, 0], sizes = [2, 32], strides = [1, 1]} : vector<2x128xf32> to vector<2x32xf32>
    %173 = vector.extract_strided_slice %171 {offsets = [0, 32], sizes = [2, 32], strides = [1, 1]} : vector<2x128xf32> to vector<2x32xf32>
    %174 = vector.extract_strided_slice %171 {offsets = [0, 64], sizes = [2, 32], strides = [1, 1]} : vector<2x128xf32> to vector<2x32xf32>
    %175 = vector.extract_strided_slice %171 {offsets = [0, 96], sizes = [2, 32], strides = [1, 1]} : vector<2x128xf32> to vector<2x32xf32>
    %176 = arith.mulf %173, %113 : vector<2x32xf32>
    %177 = arith.mulf %172, %174 : vector<2x32xf32>
    %178 = arith.addf %176, %177 : vector<2x32xf32>
    %179 = math.tanh %178 : vector<2x32xf32>
    %180 = arith.mulf %175, %179 : vector<2x32xf32>
    %181 = tpu.concatenate %180, %137 in 1 : vector<2x32xf32>, vector<2x32xf32> -> vector<2x64xf32>
    %cst_67 = arith.constant dense<0.000000e+00> : vector<2x128xf32>
    %182 = tpu.matmul %181, %5, %cst_67 {dimension_numbers = #tpu.dot_dimension_numbers<[1], [0], [0], [1], [0, 0, 1, 1], [], []>} : vector<2x64xf32>, vector<64x128xf32>, vector<2x128xf32> -> vector<2x128xf32>
    %183 = vector.broadcast %7 : vector<1x128xf32> to vector<2x128xf32>
    %184 = arith.addf %182, %183 : vector<2x128xf32>
    %cst_68 = arith.constant 5.000000e-01 : f32
    %185 = vector.broadcast %cst_68 : f32 to vector<2x128xf32>
    %186 = arith.mulf %185, %184 : vector<2x128xf32>
    %187 = arith.select %15, %184, %186 : vector<2x128xi1>, vector<2x128xf32>
    %188 = math.tanh %187 : vector<2x128xf32>
    %cst_69 = arith.constant 5.000000e-01 : f32
    %189 = vector.broadcast %cst_69 : f32 to vector<2x128xf32>
    %190 = arith.mulf %189, %188 : vector<2x128xf32>
    %cst_70 = arith.constant 5.000000e-01 : f32
    %191 = vector.broadcast %cst_70 : f32 to vector<2x128xf32>
    %192 = arith.addf %190, %191 : vector<2x128xf32>
    %193 = arith.select %15, %188, %192 : vector<2x128xi1>, vector<2x128xf32>
    %194 = vector.extract_strided_slice %193 {offsets = [0, 0], sizes = [2, 32], strides = [1, 1]} : vector<2x128xf32> to vector<2x32xf32>
    %195 = vector.extract_strided_slice %193 {offsets = [0, 32], sizes = [2, 32], strides = [1, 1]} : vector<2x128xf32> to vector<2x32xf32>
    %196 = vector.extract_strided_slice %193 {offsets = [0, 64], sizes = [2, 32], strides = [1, 1]} : vector<2x128xf32> to vector<2x32xf32>
    %197 = vector.extract_strided_slice %193 {offsets = [0, 96], sizes = [2, 32], strides = [1, 1]} : vector<2x128xf32> to vector<2x32xf32>
    %198 = arith.mulf %195, %135 : vector<2x32xf32>
    %199 = arith.mulf %194, %196 : vector<2x32xf32>
    %200 = arith.addf %198, %199 : vector<2x32xf32>
    %201 = math.tanh %200 : vector<2x32xf32>
    %202 = arith.mulf %197, %201 : vector<2x32xf32>
    %cst_71 = arith.constant dense<0.000000e+00> : vector<2x1xf32>
    %203 = tpu.matmul %202, %8, %cst_71 {dimension_numbers = #tpu.dot_dimension_numbers<[1], [0], [0], [1], [0, 0, 1, 1], [], []>} : vector<2x32xf32>, vector<32x1xf32>, vector<2x1xf32> -> vector<2x1xf32>
    %204 = vector.broadcast %9 : vector<1x1xf32> to vector<2x1xf32>
    %205 = arith.addf %203, %204 : vector<2x1xf32>
    %cst_72 = arith.constant dense<0xFF800000> : vector<2xf32>
    %206 = vector.multi_reduction <maximumf>, %205, %cst_72 [1] : vector<2x1xf32> to vector<2xf32>
    %207 = vector.shape_cast %206 : vector<2xf32> to vector<2x1xf32>
    %208 = arith.subf %205, %207 : vector<2x1xf32>
    %209 = math.exp %208 : vector<2x1xf32>
    %cst_73 = arith.constant dense<0.000000e+00> : vector<2xf32>
    %210 = vector.multi_reduction <add>, %209, %cst_73 [1] : vector<2x1xf32> to vector<2xf32>
    %211 = vector.shape_cast %210 : vector<2xf32> to vector<2x1xf32>
    %212 = math.log %211 : vector<2x1xf32>
    %213 = arith.addf %212, %207 : vector<2x1xf32>
    %214 = arith.subf %205, %213 : vector<2x1xf32>
    %c3 = arith.constant 3 : index
    %c0_74 = arith.constant 0 : index
    %c0_75 = arith.constant 0 : index
    %215 = vector.load %arg0[%c3, %c0_74, %c0_75] : memref<8x16x4xf32, #tpu.memory_space<vmem>>, vector<1x16x4xf32>
    %216 = vector.shape_cast %215 : vector<1x16x4xf32> to vector<16x4xf32>
    %cst_76 = arith.constant dense<0.000000e+00> : vector<16x4xf32>
    %217 = tpu.matmul %0, %216, %cst_76 {dimension_numbers = #tpu.dot_dimension_numbers<[1], [0], [0], [1], [0, 0, 1, 1], [], []>} : vector<16x16xf32>, vector<16x4xf32>, vector<16x4xf32> -> vector<16x4xf32>
    %cst_77 = arith.constant dense<0.000000e+00> : vector<16x16xf32>
    %218 = tpu.matmul %217, %2, %cst_77 {dimension_numbers = #tpu.dot_dimension_numbers<[1], [0], [0], [1], [0, 0, 1, 1], [], []>} : vector<16x4xf32>, vector<4x16xf32>, vector<16x16xf32> -> vector<16x16xf32>
    %219 = vector.broadcast %3 : vector<1x16xf32> to vector<16x16xf32>
    %220 = arith.addf %218, %219 : vector<16x16xf32>
    %cst_78 = arith.constant 0.000000e+00 : f32
    %221 = vector.broadcast %cst_78 : f32 to vector<16x16xf32>
    %222 = arith.maximumf %220, %221 : vector<16x16xf32>
    %cst_79 = arith.constant dense<0.000000e+00> : vector<2x16xf32>
    %223 = tpu.matmul %1, %222, %cst_79 {dimension_numbers = #tpu.dot_dimension_numbers<[1], [0], [0], [1], [0, 0, 1, 1], [], []>} : vector<2x16xf32>, vector<16x16xf32>, vector<2x16xf32> -> vector<2x16xf32>
    %224 = tpu.concatenate %223, %180 in 1 : vector<2x16xf32>, vector<2x32xf32> -> vector<2x48xf32>
    %cst_80 = arith.constant dense<0.000000e+00> : vector<2x128xf32>
    %225 = tpu.matmul %224, %4, %cst_80 {dimension_numbers = #tpu.dot_dimension_numbers<[1], [0], [0], [1], [0, 0, 1, 1], [], []>} : vector<2x48xf32>, vector<48x128xf32>, vector<2x128xf32> -> vector<2x128xf32>
    %226 = vector.broadcast %6 : vector<1x128xf32> to vector<2x128xf32>
    %227 = arith.addf %225, %226 : vector<2x128xf32>
    %cst_81 = arith.constant 5.000000e-01 : f32
    %228 = vector.broadcast %cst_81 : f32 to vector<2x128xf32>
    %229 = arith.mulf %228, %227 : vector<2x128xf32>
    %230 = arith.select %15, %227, %229 : vector<2x128xi1>, vector<2x128xf32>
    %231 = math.tanh %230 : vector<2x128xf32>
    %cst_82 = arith.constant 5.000000e-01 : f32
    %232 = vector.broadcast %cst_82 : f32 to vector<2x128xf32>
    %233 = arith.mulf %232, %231 : vector<2x128xf32>
    %cst_83 = arith.constant 5.000000e-01 : f32
    %234 = vector.broadcast %cst_83 : f32 to vector<2x128xf32>
    %235 = arith.addf %233, %234 : vector<2x128xf32>
    %236 = arith.select %15, %231, %235 : vector<2x128xi1>, vector<2x128xf32>
    %237 = vector.extract_strided_slice %236 {offsets = [0, 0], sizes = [2, 32], strides = [1, 1]} : vector<2x128xf32> to vector<2x32xf32>
    %238 = vector.extract_strided_slice %236 {offsets = [0, 32], sizes = [2, 32], strides = [1, 1]} : vector<2x128xf32> to vector<2x32xf32>
    %239 = vector.extract_strided_slice %236 {offsets = [0, 64], sizes = [2, 32], strides = [1, 1]} : vector<2x128xf32> to vector<2x32xf32>
    %240 = vector.extract_strided_slice %236 {offsets = [0, 96], sizes = [2, 32], strides = [1, 1]} : vector<2x128xf32> to vector<2x32xf32>
    %241 = arith.mulf %238, %178 : vector<2x32xf32>
    %242 = arith.mulf %237, %239 : vector<2x32xf32>
    %243 = arith.addf %241, %242 : vector<2x32xf32>
    %244 = math.tanh %243 : vector<2x32xf32>
    %245 = arith.mulf %240, %244 : vector<2x32xf32>
    %246 = tpu.concatenate %245, %202 in 1 : vector<2x32xf32>, vector<2x32xf32> -> vector<2x64xf32>
    %cst_84 = arith.constant dense<0.000000e+00> : vector<2x128xf32>
    %247 = tpu.matmul %246, %5, %cst_84 {dimension_numbers = #tpu.dot_dimension_numbers<[1], [0], [0], [1], [0, 0, 1, 1], [], []>} : vector<2x64xf32>, vector<64x128xf32>, vector<2x128xf32> -> vector<2x128xf32>
    %248 = vector.broadcast %7 : vector<1x128xf32> to vector<2x128xf32>
    %249 = arith.addf %247, %248 : vector<2x128xf32>
    %cst_85 = arith.constant 5.000000e-01 : f32
    %250 = vector.broadcast %cst_85 : f32 to vector<2x128xf32>
    %251 = arith.mulf %250, %249 : vector<2x128xf32>
    %252 = arith.select %15, %249, %251 : vector<2x128xi1>, vector<2x128xf32>
    %253 = math.tanh %252 : vector<2x128xf32>
    %cst_86 = arith.constant 5.000000e-01 : f32
    %254 = vector.broadcast %cst_86 : f32 to vector<2x128xf32>
    %255 = arith.mulf %254, %253 : vector<2x128xf32>
    %cst_87 = arith.constant 5.000000e-01 : f32
    %256 = vector.broadcast %cst_87 : f32 to vector<2x128xf32>
    %257 = arith.addf %255, %256 : vector<2x128xf32>
    %258 = arith.select %15, %253, %257 : vector<2x128xi1>, vector<2x128xf32>
    %259 = vector.extract_strided_slice %258 {offsets = [0, 0], sizes = [2, 32], strides = [1, 1]} : vector<2x128xf32> to vector<2x32xf32>
    %260 = vector.extract_strided_slice %258 {offsets = [0, 32], sizes = [2, 32], strides = [1, 1]} : vector<2x128xf32> to vector<2x32xf32>
    %261 = vector.extract_strided_slice %258 {offsets = [0, 64], sizes = [2, 32], strides = [1, 1]} : vector<2x128xf32> to vector<2x32xf32>
    %262 = vector.extract_strided_slice %258 {offsets = [0, 96], sizes = [2, 32], strides = [1, 1]} : vector<2x128xf32> to vector<2x32xf32>
    %263 = arith.mulf %260, %200 : vector<2x32xf32>
    %264 = arith.mulf %259, %261 : vector<2x32xf32>
    %265 = arith.addf %263, %264 : vector<2x32xf32>
    %266 = math.tanh %265 : vector<2x32xf32>
    %267 = arith.mulf %262, %266 : vector<2x32xf32>
    %cst_88 = arith.constant dense<0.000000e+00> : vector<2x1xf32>
    %268 = tpu.matmul %267, %8, %cst_88 {dimension_numbers = #tpu.dot_dimension_numbers<[1], [0], [0], [1], [0, 0, 1, 1], [], []>} : vector<2x32xf32>, vector<32x1xf32>, vector<2x1xf32> -> vector<2x1xf32>
    %269 = vector.broadcast %9 : vector<1x1xf32> to vector<2x1xf32>
    %270 = arith.addf %268, %269 : vector<2x1xf32>
    %cst_89 = arith.constant dense<0xFF800000> : vector<2xf32>
    %271 = vector.multi_reduction <maximumf>, %270, %cst_89 [1] : vector<2x1xf32> to vector<2xf32>
    %272 = vector.shape_cast %271 : vector<2xf32> to vector<2x1xf32>
    %273 = arith.subf %270, %272 : vector<2x1xf32>
    %274 = math.exp %273 : vector<2x1xf32>
    %cst_90 = arith.constant dense<0.000000e+00> : vector<2xf32>
    %275 = vector.multi_reduction <add>, %274, %cst_90 [1] : vector<2x1xf32> to vector<2xf32>
    %276 = vector.shape_cast %275 : vector<2xf32> to vector<2x1xf32>
    %277 = math.log %276 : vector<2x1xf32>
    %278 = arith.addf %277, %272 : vector<2x1xf32>
    %279 = arith.subf %270, %278 : vector<2x1xf32>
    %c4 = arith.constant 4 : index
    %c0_91 = arith.constant 0 : index
    %c0_92 = arith.constant 0 : index
    %280 = vector.load %arg0[%c4, %c0_91, %c0_92] : memref<8x16x4xf32, #tpu.memory_space<vmem>>, vector<1x16x4xf32>
    %281 = vector.shape_cast %280 : vector<1x16x4xf32> to vector<16x4xf32>
    %cst_93 = arith.constant dense<0.000000e+00> : vector<16x4xf32>
    %282 = tpu.matmul %0, %281, %cst_93 {dimension_numbers = #tpu.dot_dimension_numbers<[1], [0], [0], [1], [0, 0, 1, 1], [], []>} : vector<16x16xf32>, vector<16x4xf32>, vector<16x4xf32> -> vector<16x4xf32>
    %cst_94 = arith.constant dense<0.000000e+00> : vector<16x16xf32>
    %283 = tpu.matmul %282, %2, %cst_94 {dimension_numbers = #tpu.dot_dimension_numbers<[1], [0], [0], [1], [0, 0, 1, 1], [], []>} : vector<16x4xf32>, vector<4x16xf32>, vector<16x16xf32> -> vector<16x16xf32>
    %284 = vector.broadcast %3 : vector<1x16xf32> to vector<16x16xf32>
    %285 = arith.addf %283, %284 : vector<16x16xf32>
    %cst_95 = arith.constant 0.000000e+00 : f32
    %286 = vector.broadcast %cst_95 : f32 to vector<16x16xf32>
    %287 = arith.maximumf %285, %286 : vector<16x16xf32>
    %cst_96 = arith.constant dense<0.000000e+00> : vector<2x16xf32>
    %288 = tpu.matmul %1, %287, %cst_96 {dimension_numbers = #tpu.dot_dimension_numbers<[1], [0], [0], [1], [0, 0, 1, 1], [], []>} : vector<2x16xf32>, vector<16x16xf32>, vector<2x16xf32> -> vector<2x16xf32>
    %289 = tpu.concatenate %288, %245 in 1 : vector<2x16xf32>, vector<2x32xf32> -> vector<2x48xf32>
    %cst_97 = arith.constant dense<0.000000e+00> : vector<2x128xf32>
    %290 = tpu.matmul %289, %4, %cst_97 {dimension_numbers = #tpu.dot_dimension_numbers<[1], [0], [0], [1], [0, 0, 1, 1], [], []>} : vector<2x48xf32>, vector<48x128xf32>, vector<2x128xf32> -> vector<2x128xf32>
    %291 = vector.broadcast %6 : vector<1x128xf32> to vector<2x128xf32>
    %292 = arith.addf %290, %291 : vector<2x128xf32>
    %cst_98 = arith.constant 5.000000e-01 : f32
    %293 = vector.broadcast %cst_98 : f32 to vector<2x128xf32>
    %294 = arith.mulf %293, %292 : vector<2x128xf32>
    %295 = arith.select %15, %292, %294 : vector<2x128xi1>, vector<2x128xf32>
    %296 = math.tanh %295 : vector<2x128xf32>
    %cst_99 = arith.constant 5.000000e-01 : f32
    %297 = vector.broadcast %cst_99 : f32 to vector<2x128xf32>
    %298 = arith.mulf %297, %296 : vector<2x128xf32>
    %cst_100 = arith.constant 5.000000e-01 : f32
    %299 = vector.broadcast %cst_100 : f32 to vector<2x128xf32>
    %300 = arith.addf %298, %299 : vector<2x128xf32>
    %301 = arith.select %15, %296, %300 : vector<2x128xi1>, vector<2x128xf32>
    %302 = vector.extract_strided_slice %301 {offsets = [0, 0], sizes = [2, 32], strides = [1, 1]} : vector<2x128xf32> to vector<2x32xf32>
    %303 = vector.extract_strided_slice %301 {offsets = [0, 32], sizes = [2, 32], strides = [1, 1]} : vector<2x128xf32> to vector<2x32xf32>
    %304 = vector.extract_strided_slice %301 {offsets = [0, 64], sizes = [2, 32], strides = [1, 1]} : vector<2x128xf32> to vector<2x32xf32>
    %305 = vector.extract_strided_slice %301 {offsets = [0, 96], sizes = [2, 32], strides = [1, 1]} : vector<2x128xf32> to vector<2x32xf32>
    %306 = arith.mulf %303, %243 : vector<2x32xf32>
    %307 = arith.mulf %302, %304 : vector<2x32xf32>
    %308 = arith.addf %306, %307 : vector<2x32xf32>
    %309 = math.tanh %308 : vector<2x32xf32>
    %310 = arith.mulf %305, %309 : vector<2x32xf32>
    %311 = tpu.concatenate %310, %267 in 1 : vector<2x32xf32>, vector<2x32xf32> -> vector<2x64xf32>
    %cst_101 = arith.constant dense<0.000000e+00> : vector<2x128xf32>
    %312 = tpu.matmul %311, %5, %cst_101 {dimension_numbers = #tpu.dot_dimension_numbers<[1], [0], [0], [1], [0, 0, 1, 1], [], []>} : vector<2x64xf32>, vector<64x128xf32>, vector<2x128xf32> -> vector<2x128xf32>
    %313 = vector.broadcast %7 : vector<1x128xf32> to vector<2x128xf32>
    %314 = arith.addf %312, %313 : vector<2x128xf32>
    %cst_102 = arith.constant 5.000000e-01 : f32
    %315 = vector.broadcast %cst_102 : f32 to vector<2x128xf32>
    %316 = arith.mulf %315, %314 : vector<2x128xf32>
    %317 = arith.select %15, %314, %316 : vector<2x128xi1>, vector<2x128xf32>
    %318 = math.tanh %317 : vector<2x128xf32>
    %cst_103 = arith.constant 5.000000e-01 : f32
    %319 = vector.broadcast %cst_103 : f32 to vector<2x128xf32>
    %320 = arith.mulf %319, %318 : vector<2x128xf32>
    %cst_104 = arith.constant 5.000000e-01 : f32
    %321 = vector.broadcast %cst_104 : f32 to vector<2x128xf32>
    %322 = arith.addf %320, %321 : vector<2x128xf32>
    %323 = arith.select %15, %318, %322 : vector<2x128xi1>, vector<2x128xf32>
    %324 = vector.extract_strided_slice %323 {offsets = [0, 0], sizes = [2, 32], strides = [1, 1]} : vector<2x128xf32> to vector<2x32xf32>
    %325 = vector.extract_strided_slice %323 {offsets = [0, 32], sizes = [2, 32], strides = [1, 1]} : vector<2x128xf32> to vector<2x32xf32>
    %326 = vector.extract_strided_slice %323 {offsets = [0, 64], sizes = [2, 32], strides = [1, 1]} : vector<2x128xf32> to vector<2x32xf32>
    %327 = vector.extract_strided_slice %323 {offsets = [0, 96], sizes = [2, 32], strides = [1, 1]} : vector<2x128xf32> to vector<2x32xf32>
    %328 = arith.mulf %325, %265 : vector<2x32xf32>
    %329 = arith.mulf %324, %326 : vector<2x32xf32>
    %330 = arith.addf %328, %329 : vector<2x32xf32>
    %331 = math.tanh %330 : vector<2x32xf32>
    %332 = arith.mulf %327, %331 : vector<2x32xf32>
    %cst_105 = arith.constant dense<0.000000e+00> : vector<2x1xf32>
    %333 = tpu.matmul %332, %8, %cst_105 {dimension_numbers = #tpu.dot_dimension_numbers<[1], [0], [0], [1], [0, 0, 1, 1], [], []>} : vector<2x32xf32>, vector<32x1xf32>, vector<2x1xf32> -> vector<2x1xf32>
    %334 = vector.broadcast %9 : vector<1x1xf32> to vector<2x1xf32>
    %335 = arith.addf %333, %334 : vector<2x1xf32>
    %cst_106 = arith.constant dense<0xFF800000> : vector<2xf32>
    %336 = vector.multi_reduction <maximumf>, %335, %cst_106 [1] : vector<2x1xf32> to vector<2xf32>
    %337 = vector.shape_cast %336 : vector<2xf32> to vector<2x1xf32>
    %338 = arith.subf %335, %337 : vector<2x1xf32>
    %339 = math.exp %338 : vector<2x1xf32>
    %cst_107 = arith.constant dense<0.000000e+00> : vector<2xf32>
    %340 = vector.multi_reduction <add>, %339, %cst_107 [1] : vector<2x1xf32> to vector<2xf32>
    %341 = vector.shape_cast %340 : vector<2xf32> to vector<2x1xf32>
    %342 = math.log %341 : vector<2x1xf32>
    %343 = arith.addf %342, %337 : vector<2x1xf32>
    %344 = arith.subf %335, %343 : vector<2x1xf32>
    %c5 = arith.constant 5 : index
    %c0_108 = arith.constant 0 : index
    %c0_109 = arith.constant 0 : index
    %345 = vector.load %arg0[%c5, %c0_108, %c0_109] : memref<8x16x4xf32, #tpu.memory_space<vmem>>, vector<1x16x4xf32>
    %346 = vector.shape_cast %345 : vector<1x16x4xf32> to vector<16x4xf32>
    %cst_110 = arith.constant dense<0.000000e+00> : vector<16x4xf32>
    %347 = tpu.matmul %0, %346, %cst_110 {dimension_numbers = #tpu.dot_dimension_numbers<[1], [0], [0], [1], [0, 0, 1, 1], [], []>} : vector<16x16xf32>, vector<16x4xf32>, vector<16x4xf32> -> vector<16x4xf32>
    %cst_111 = arith.constant dense<0.000000e+00> : vector<16x16xf32>
    %348 = tpu.matmul %347, %2, %cst_111 {dimension_numbers = #tpu.dot_dimension_numbers<[1], [0], [0], [1], [0, 0, 1, 1], [], []>} : vector<16x4xf32>, vector<4x16xf32>, vector<16x16xf32> -> vector<16x16xf32>
    %349 = vector.broadcast %3 : vector<1x16xf32> to vector<16x16xf32>
    %350 = arith.addf %348, %349 : vector<16x16xf32>
    %cst_112 = arith.constant 0.000000e+00 : f32
    %351 = vector.broadcast %cst_112 : f32 to vector<16x16xf32>
    %352 = arith.maximumf %350, %351 : vector<16x16xf32>
    %cst_113 = arith.constant dense<0.000000e+00> : vector<2x16xf32>
    %353 = tpu.matmul %1, %352, %cst_113 {dimension_numbers = #tpu.dot_dimension_numbers<[1], [0], [0], [1], [0, 0, 1, 1], [], []>} : vector<2x16xf32>, vector<16x16xf32>, vector<2x16xf32> -> vector<2x16xf32>
    %354 = tpu.concatenate %353, %310 in 1 : vector<2x16xf32>, vector<2x32xf32> -> vector<2x48xf32>
    %cst_114 = arith.constant dense<0.000000e+00> : vector<2x128xf32>
    %355 = tpu.matmul %354, %4, %cst_114 {dimension_numbers = #tpu.dot_dimension_numbers<[1], [0], [0], [1], [0, 0, 1, 1], [], []>} : vector<2x48xf32>, vector<48x128xf32>, vector<2x128xf32> -> vector<2x128xf32>
    %356 = vector.broadcast %6 : vector<1x128xf32> to vector<2x128xf32>
    %357 = arith.addf %355, %356 : vector<2x128xf32>
    %cst_115 = arith.constant 5.000000e-01 : f32
    %358 = vector.broadcast %cst_115 : f32 to vector<2x128xf32>
    %359 = arith.mulf %358, %357 : vector<2x128xf32>
    %360 = arith.select %15, %357, %359 : vector<2x128xi1>, vector<2x128xf32>
    %361 = math.tanh %360 : vector<2x128xf32>
    %cst_116 = arith.constant 5.000000e-01 : f32
    %362 = vector.broadcast %cst_116 : f32 to vector<2x128xf32>
    %363 = arith.mulf %362, %361 : vector<2x128xf32>
    %cst_117 = arith.constant 5.000000e-01 : f32
    %364 = vector.broadcast %cst_117 : f32 to vector<2x128xf32>
    %365 = arith.addf %363, %364 : vector<2x128xf32>
    %366 = arith.select %15, %361, %365 : vector<2x128xi1>, vector<2x128xf32>
    %367 = vector.extract_strided_slice %366 {offsets = [0, 0], sizes = [2, 32], strides = [1, 1]} : vector<2x128xf32> to vector<2x32xf32>
    %368 = vector.extract_strided_slice %366 {offsets = [0, 32], sizes = [2, 32], strides = [1, 1]} : vector<2x128xf32> to vector<2x32xf32>
    %369 = vector.extract_strided_slice %366 {offsets = [0, 64], sizes = [2, 32], strides = [1, 1]} : vector<2x128xf32> to vector<2x32xf32>
    %370 = vector.extract_strided_slice %366 {offsets = [0, 96], sizes = [2, 32], strides = [1, 1]} : vector<2x128xf32> to vector<2x32xf32>
    %371 = arith.mulf %368, %308 : vector<2x32xf32>
    %372 = arith.mulf %367, %369 : vector<2x32xf32>
    %373 = arith.addf %371, %372 : vector<2x32xf32>
    %374 = math.tanh %373 : vector<2x32xf32>
    %375 = arith.mulf %370, %374 : vector<2x32xf32>
    %376 = tpu.concatenate %375, %332 in 1 : vector<2x32xf32>, vector<2x32xf32> -> vector<2x64xf32>
    %cst_118 = arith.constant dense<0.000000e+00> : vector<2x128xf32>
    %377 = tpu.matmul %376, %5, %cst_118 {dimension_numbers = #tpu.dot_dimension_numbers<[1], [0], [0], [1], [0, 0, 1, 1], [], []>} : vector<2x64xf32>, vector<64x128xf32>, vector<2x128xf32> -> vector<2x128xf32>
    %378 = vector.broadcast %7 : vector<1x128xf32> to vector<2x128xf32>
    %379 = arith.addf %377, %378 : vector<2x128xf32>
    %cst_119 = arith.constant 5.000000e-01 : f32
    %380 = vector.broadcast %cst_119 : f32 to vector<2x128xf32>
    %381 = arith.mulf %380, %379 : vector<2x128xf32>
    %382 = arith.select %15, %379, %381 : vector<2x128xi1>, vector<2x128xf32>
    %383 = math.tanh %382 : vector<2x128xf32>
    %cst_120 = arith.constant 5.000000e-01 : f32
    %384 = vector.broadcast %cst_120 : f32 to vector<2x128xf32>
    %385 = arith.mulf %384, %383 : vector<2x128xf32>
    %cst_121 = arith.constant 5.000000e-01 : f32
    %386 = vector.broadcast %cst_121 : f32 to vector<2x128xf32>
    %387 = arith.addf %385, %386 : vector<2x128xf32>
    %388 = arith.select %15, %383, %387 : vector<2x128xi1>, vector<2x128xf32>
    %389 = vector.extract_strided_slice %388 {offsets = [0, 0], sizes = [2, 32], strides = [1, 1]} : vector<2x128xf32> to vector<2x32xf32>
    %390 = vector.extract_strided_slice %388 {offsets = [0, 32], sizes = [2, 32], strides = [1, 1]} : vector<2x128xf32> to vector<2x32xf32>
    %391 = vector.extract_strided_slice %388 {offsets = [0, 64], sizes = [2, 32], strides = [1, 1]} : vector<2x128xf32> to vector<2x32xf32>
    %392 = vector.extract_strided_slice %388 {offsets = [0, 96], sizes = [2, 32], strides = [1, 1]} : vector<2x128xf32> to vector<2x32xf32>
    %393 = arith.mulf %390, %330 : vector<2x32xf32>
    %394 = arith.mulf %389, %391 : vector<2x32xf32>
    %395 = arith.addf %393, %394 : vector<2x32xf32>
    %396 = math.tanh %395 : vector<2x32xf32>
    %397 = arith.mulf %392, %396 : vector<2x32xf32>
    %cst_122 = arith.constant dense<0.000000e+00> : vector<2x1xf32>
    %398 = tpu.matmul %397, %8, %cst_122 {dimension_numbers = #tpu.dot_dimension_numbers<[1], [0], [0], [1], [0, 0, 1, 1], [], []>} : vector<2x32xf32>, vector<32x1xf32>, vector<2x1xf32> -> vector<2x1xf32>
    %399 = vector.broadcast %9 : vector<1x1xf32> to vector<2x1xf32>
    %400 = arith.addf %398, %399 : vector<2x1xf32>
    %cst_123 = arith.constant dense<0xFF800000> : vector<2xf32>
    %401 = vector.multi_reduction <maximumf>, %400, %cst_123 [1] : vector<2x1xf32> to vector<2xf32>
    %402 = vector.shape_cast %401 : vector<2xf32> to vector<2x1xf32>
    %403 = arith.subf %400, %402 : vector<2x1xf32>
    %404 = math.exp %403 : vector<2x1xf32>
    %cst_124 = arith.constant dense<0.000000e+00> : vector<2xf32>
    %405 = vector.multi_reduction <add>, %404, %cst_124 [1] : vector<2x1xf32> to vector<2xf32>
    %406 = vector.shape_cast %405 : vector<2xf32> to vector<2x1xf32>
    %407 = math.log %406 : vector<2x1xf32>
    %408 = arith.addf %407, %402 : vector<2x1xf32>
    %409 = arith.subf %400, %408 : vector<2x1xf32>
    %c6 = arith.constant 6 : index
    %c0_125 = arith.constant 0 : index
    %c0_126 = arith.constant 0 : index
    %410 = vector.load %arg0[%c6, %c0_125, %c0_126] : memref<8x16x4xf32, #tpu.memory_space<vmem>>, vector<1x16x4xf32>
    %411 = vector.shape_cast %410 : vector<1x16x4xf32> to vector<16x4xf32>
    %cst_127 = arith.constant dense<0.000000e+00> : vector<16x4xf32>
    %412 = tpu.matmul %0, %411, %cst_127 {dimension_numbers = #tpu.dot_dimension_numbers<[1], [0], [0], [1], [0, 0, 1, 1], [], []>} : vector<16x16xf32>, vector<16x4xf32>, vector<16x4xf32> -> vector<16x4xf32>
    %cst_128 = arith.constant dense<0.000000e+00> : vector<16x16xf32>
    %413 = tpu.matmul %412, %2, %cst_128 {dimension_numbers = #tpu.dot_dimension_numbers<[1], [0], [0], [1], [0, 0, 1, 1], [], []>} : vector<16x4xf32>, vector<4x16xf32>, vector<16x16xf32> -> vector<16x16xf32>
    %414 = vector.broadcast %3 : vector<1x16xf32> to vector<16x16xf32>
    %415 = arith.addf %413, %414 : vector<16x16xf32>
    %cst_129 = arith.constant 0.000000e+00 : f32
    %416 = vector.broadcast %cst_129 : f32 to vector<16x16xf32>
    %417 = arith.maximumf %415, %416 : vector<16x16xf32>
    %cst_130 = arith.constant dense<0.000000e+00> : vector<2x16xf32>
    %418 = tpu.matmul %1, %417, %cst_130 {dimension_numbers = #tpu.dot_dimension_numbers<[1], [0], [0], [1], [0, 0, 1, 1], [], []>} : vector<2x16xf32>, vector<16x16xf32>, vector<2x16xf32> -> vector<2x16xf32>
    %419 = tpu.concatenate %418, %375 in 1 : vector<2x16xf32>, vector<2x32xf32> -> vector<2x48xf32>
    %cst_131 = arith.constant dense<0.000000e+00> : vector<2x128xf32>
    %420 = tpu.matmul %419, %4, %cst_131 {dimension_numbers = #tpu.dot_dimension_numbers<[1], [0], [0], [1], [0, 0, 1, 1], [], []>} : vector<2x48xf32>, vector<48x128xf32>, vector<2x128xf32> -> vector<2x128xf32>
    %421 = vector.broadcast %6 : vector<1x128xf32> to vector<2x128xf32>
    %422 = arith.addf %420, %421 : vector<2x128xf32>
    %cst_132 = arith.constant 5.000000e-01 : f32
    %423 = vector.broadcast %cst_132 : f32 to vector<2x128xf32>
    %424 = arith.mulf %423, %422 : vector<2x128xf32>
    %425 = arith.select %15, %422, %424 : vector<2x128xi1>, vector<2x128xf32>
    %426 = math.tanh %425 : vector<2x128xf32>
    %cst_133 = arith.constant 5.000000e-01 : f32
    %427 = vector.broadcast %cst_133 : f32 to vector<2x128xf32>
    %428 = arith.mulf %427, %426 : vector<2x128xf32>
    %cst_134 = arith.constant 5.000000e-01 : f32
    %429 = vector.broadcast %cst_134 : f32 to vector<2x128xf32>
    %430 = arith.addf %428, %429 : vector<2x128xf32>
    %431 = arith.select %15, %426, %430 : vector<2x128xi1>, vector<2x128xf32>
    %432 = vector.extract_strided_slice %431 {offsets = [0, 0], sizes = [2, 32], strides = [1, 1]} : vector<2x128xf32> to vector<2x32xf32>
    %433 = vector.extract_strided_slice %431 {offsets = [0, 32], sizes = [2, 32], strides = [1, 1]} : vector<2x128xf32> to vector<2x32xf32>
    %434 = vector.extract_strided_slice %431 {offsets = [0, 64], sizes = [2, 32], strides = [1, 1]} : vector<2x128xf32> to vector<2x32xf32>
    %435 = vector.extract_strided_slice %431 {offsets = [0, 96], sizes = [2, 32], strides = [1, 1]} : vector<2x128xf32> to vector<2x32xf32>
    %436 = arith.mulf %433, %373 : vector<2x32xf32>
    %437 = arith.mulf %432, %434 : vector<2x32xf32>
    %438 = arith.addf %436, %437 : vector<2x32xf32>
    %439 = math.tanh %438 : vector<2x32xf32>
    %440 = arith.mulf %435, %439 : vector<2x32xf32>
    %441 = tpu.concatenate %440, %397 in 1 : vector<2x32xf32>, vector<2x32xf32> -> vector<2x64xf32>
    %cst_135 = arith.constant dense<0.000000e+00> : vector<2x128xf32>
    %442 = tpu.matmul %441, %5, %cst_135 {dimension_numbers = #tpu.dot_dimension_numbers<[1], [0], [0], [1], [0, 0, 1, 1], [], []>} : vector<2x64xf32>, vector<64x128xf32>, vector<2x128xf32> -> vector<2x128xf32>
    %443 = vector.broadcast %7 : vector<1x128xf32> to vector<2x128xf32>
    %444 = arith.addf %442, %443 : vector<2x128xf32>
    %cst_136 = arith.constant 5.000000e-01 : f32
    %445 = vector.broadcast %cst_136 : f32 to vector<2x128xf32>
    %446 = arith.mulf %445, %444 : vector<2x128xf32>
    %447 = arith.select %15, %444, %446 : vector<2x128xi1>, vector<2x128xf32>
    %448 = math.tanh %447 : vector<2x128xf32>
    %cst_137 = arith.constant 5.000000e-01 : f32
    %449 = vector.broadcast %cst_137 : f32 to vector<2x128xf32>
    %450 = arith.mulf %449, %448 : vector<2x128xf32>
    %cst_138 = arith.constant 5.000000e-01 : f32
    %451 = vector.broadcast %cst_138 : f32 to vector<2x128xf32>
    %452 = arith.addf %450, %451 : vector<2x128xf32>
    %453 = arith.select %15, %448, %452 : vector<2x128xi1>, vector<2x128xf32>
    %454 = vector.extract_strided_slice %453 {offsets = [0, 0], sizes = [2, 32], strides = [1, 1]} : vector<2x128xf32> to vector<2x32xf32>
    %455 = vector.extract_strided_slice %453 {offsets = [0, 32], sizes = [2, 32], strides = [1, 1]} : vector<2x128xf32> to vector<2x32xf32>
    %456 = vector.extract_strided_slice %453 {offsets = [0, 64], sizes = [2, 32], strides = [1, 1]} : vector<2x128xf32> to vector<2x32xf32>
    %457 = vector.extract_strided_slice %453 {offsets = [0, 96], sizes = [2, 32], strides = [1, 1]} : vector<2x128xf32> to vector<2x32xf32>
    %458 = arith.mulf %455, %395 : vector<2x32xf32>
    %459 = arith.mulf %454, %456 : vector<2x32xf32>
    %460 = arith.addf %458, %459 : vector<2x32xf32>
    %461 = math.tanh %460 : vector<2x32xf32>
    %462 = arith.mulf %457, %461 : vector<2x32xf32>
    %cst_139 = arith.constant dense<0.000000e+00> : vector<2x1xf32>
    %463 = tpu.matmul %462, %8, %cst_139 {dimension_numbers = #tpu.dot_dimension_numbers<[1], [0], [0], [1], [0, 0, 1, 1], [], []>} : vector<2x32xf32>, vector<32x1xf32>, vector<2x1xf32> -> vector<2x1xf32>
    %464 = vector.broadcast %9 : vector<1x1xf32> to vector<2x1xf32>
    %465 = arith.addf %463, %464 : vector<2x1xf32>
    %cst_140 = arith.constant dense<0xFF800000> : vector<2xf32>
    %466 = vector.multi_reduction <maximumf>, %465, %cst_140 [1] : vector<2x1xf32> to vector<2xf32>
    %467 = vector.shape_cast %466 : vector<2xf32> to vector<2x1xf32>
    %468 = arith.subf %465, %467 : vector<2x1xf32>
    %469 = math.exp %468 : vector<2x1xf32>
    %cst_141 = arith.constant dense<0.000000e+00> : vector<2xf32>
    %470 = vector.multi_reduction <add>, %469, %cst_141 [1] : vector<2x1xf32> to vector<2xf32>
    %471 = vector.shape_cast %470 : vector<2xf32> to vector<2x1xf32>
    %472 = math.log %471 : vector<2x1xf32>
    %473 = arith.addf %472, %467 : vector<2x1xf32>
    %474 = arith.subf %465, %473 : vector<2x1xf32>
    %c7 = arith.constant 7 : index
    %c0_142 = arith.constant 0 : index
    %c0_143 = arith.constant 0 : index
    %475 = vector.load %arg0[%c7, %c0_142, %c0_143] : memref<8x16x4xf32, #tpu.memory_space<vmem>>, vector<1x16x4xf32>
    %476 = vector.shape_cast %475 : vector<1x16x4xf32> to vector<16x4xf32>
    %cst_144 = arith.constant dense<0.000000e+00> : vector<16x4xf32>
    %477 = tpu.matmul %0, %476, %cst_144 {dimension_numbers = #tpu.dot_dimension_numbers<[1], [0], [0], [1], [0, 0, 1, 1], [], []>} : vector<16x16xf32>, vector<16x4xf32>, vector<16x4xf32> -> vector<16x4xf32>
    %cst_145 = arith.constant dense<0.000000e+00> : vector<16x16xf32>
    %478 = tpu.matmul %477, %2, %cst_145 {dimension_numbers = #tpu.dot_dimension_numbers<[1], [0], [0], [1], [0, 0, 1, 1], [], []>} : vector<16x4xf32>, vector<4x16xf32>, vector<16x16xf32> -> vector<16x16xf32>
    %479 = vector.broadcast %3 : vector<1x16xf32> to vector<16x16xf32>
    %480 = arith.addf %478, %479 : vector<16x16xf32>
    %cst_146 = arith.constant 0.000000e+00 : f32
    %481 = vector.broadcast %cst_146 : f32 to vector<16x16xf32>
    %482 = arith.maximumf %480, %481 : vector<16x16xf32>
    %cst_147 = arith.constant dense<0.000000e+00> : vector<2x16xf32>
    %483 = tpu.matmul %1, %482, %cst_147 {dimension_numbers = #tpu.dot_dimension_numbers<[1], [0], [0], [1], [0, 0, 1, 1], [], []>} : vector<2x16xf32>, vector<16x16xf32>, vector<2x16xf32> -> vector<2x16xf32>
    %484 = tpu.concatenate %483, %440 in 1 : vector<2x16xf32>, vector<2x32xf32> -> vector<2x48xf32>
    %cst_148 = arith.constant dense<0.000000e+00> : vector<2x128xf32>
    %485 = tpu.matmul %484, %4, %cst_148 {dimension_numbers = #tpu.dot_dimension_numbers<[1], [0], [0], [1], [0, 0, 1, 1], [], []>} : vector<2x48xf32>, vector<48x128xf32>, vector<2x128xf32> -> vector<2x128xf32>
    %486 = vector.broadcast %6 : vector<1x128xf32> to vector<2x128xf32>
    %487 = arith.addf %485, %486 : vector<2x128xf32>
    %cst_149 = arith.constant 5.000000e-01 : f32
    %488 = vector.broadcast %cst_149 : f32 to vector<2x128xf32>
    %489 = arith.mulf %488, %487 : vector<2x128xf32>
    %490 = arith.select %15, %487, %489 : vector<2x128xi1>, vector<2x128xf32>
    %491 = math.tanh %490 : vector<2x128xf32>
    %cst_150 = arith.constant 5.000000e-01 : f32
    %492 = vector.broadcast %cst_150 : f32 to vector<2x128xf32>
    %493 = arith.mulf %492, %491 : vector<2x128xf32>
    %cst_151 = arith.constant 5.000000e-01 : f32
    %494 = vector.broadcast %cst_151 : f32 to vector<2x128xf32>
    %495 = arith.addf %493, %494 : vector<2x128xf32>
    %496 = arith.select %15, %491, %495 : vector<2x128xi1>, vector<2x128xf32>
    %497 = vector.extract_strided_slice %496 {offsets = [0, 0], sizes = [2, 32], strides = [1, 1]} : vector<2x128xf32> to vector<2x32xf32>
    %498 = vector.extract_strided_slice %496 {offsets = [0, 32], sizes = [2, 32], strides = [1, 1]} : vector<2x128xf32> to vector<2x32xf32>
    %499 = vector.extract_strided_slice %496 {offsets = [0, 64], sizes = [2, 32], strides = [1, 1]} : vector<2x128xf32> to vector<2x32xf32>
    %500 = vector.extract_strided_slice %496 {offsets = [0, 96], sizes = [2, 32], strides = [1, 1]} : vector<2x128xf32> to vector<2x32xf32>
    %501 = arith.mulf %498, %438 : vector<2x32xf32>
    %502 = arith.mulf %497, %499 : vector<2x32xf32>
    %503 = arith.addf %501, %502 : vector<2x32xf32>
    %504 = math.tanh %503 : vector<2x32xf32>
    %505 = arith.mulf %500, %504 : vector<2x32xf32>
    %506 = tpu.concatenate %505, %462 in 1 : vector<2x32xf32>, vector<2x32xf32> -> vector<2x64xf32>
    %cst_152 = arith.constant dense<0.000000e+00> : vector<2x128xf32>
    %507 = tpu.matmul %506, %5, %cst_152 {dimension_numbers = #tpu.dot_dimension_numbers<[1], [0], [0], [1], [0, 0, 1, 1], [], []>} : vector<2x64xf32>, vector<64x128xf32>, vector<2x128xf32> -> vector<2x128xf32>
    %508 = vector.broadcast %7 : vector<1x128xf32> to vector<2x128xf32>
    %509 = arith.addf %507, %508 : vector<2x128xf32>
    %cst_153 = arith.constant 5.000000e-01 : f32
    %510 = vector.broadcast %cst_153 : f32 to vector<2x128xf32>
    %511 = arith.mulf %510, %509 : vector<2x128xf32>
    %512 = arith.select %15, %509, %511 : vector<2x128xi1>, vector<2x128xf32>
    %513 = math.tanh %512 : vector<2x128xf32>
    %cst_154 = arith.constant 5.000000e-01 : f32
    %514 = vector.broadcast %cst_154 : f32 to vector<2x128xf32>
    %515 = arith.mulf %514, %513 : vector<2x128xf32>
    %cst_155 = arith.constant 5.000000e-01 : f32
    %516 = vector.broadcast %cst_155 : f32 to vector<2x128xf32>
    %517 = arith.addf %515, %516 : vector<2x128xf32>
    %518 = arith.select %15, %513, %517 : vector<2x128xi1>, vector<2x128xf32>
    %519 = vector.extract_strided_slice %518 {offsets = [0, 0], sizes = [2, 32], strides = [1, 1]} : vector<2x128xf32> to vector<2x32xf32>
    %520 = vector.extract_strided_slice %518 {offsets = [0, 32], sizes = [2, 32], strides = [1, 1]} : vector<2x128xf32> to vector<2x32xf32>
    %521 = vector.extract_strided_slice %518 {offsets = [0, 64], sizes = [2, 32], strides = [1, 1]} : vector<2x128xf32> to vector<2x32xf32>
    %522 = vector.extract_strided_slice %518 {offsets = [0, 96], sizes = [2, 32], strides = [1, 1]} : vector<2x128xf32> to vector<2x32xf32>
    %523 = arith.mulf %520, %460 : vector<2x32xf32>
    %524 = arith.mulf %519, %521 : vector<2x32xf32>
    %525 = arith.addf %523, %524 : vector<2x32xf32>
    %526 = math.tanh %525 : vector<2x32xf32>
    %527 = arith.mulf %522, %526 : vector<2x32xf32>
    %cst_156 = arith.constant dense<0.000000e+00> : vector<2x1xf32>
    %528 = tpu.matmul %527, %8, %cst_156 {dimension_numbers = #tpu.dot_dimension_numbers<[1], [0], [0], [1], [0, 0, 1, 1], [], []>} : vector<2x32xf32>, vector<32x1xf32>, vector<2x1xf32> -> vector<2x1xf32>
    %529 = vector.broadcast %9 : vector<1x1xf32> to vector<2x1xf32>
    %530 = arith.addf %528, %529 : vector<2x1xf32>
    %cst_157 = arith.constant dense<0xFF800000> : vector<2xf32>
    %531 = vector.multi_reduction <maximumf>, %530, %cst_157 [1] : vector<2x1xf32> to vector<2xf32>
    %532 = vector.shape_cast %531 : vector<2xf32> to vector<2x1xf32>
    %533 = arith.subf %530, %532 : vector<2x1xf32>
    %534 = math.exp %533 : vector<2x1xf32>
    %cst_158 = arith.constant dense<0.000000e+00> : vector<2xf32>
    %535 = vector.multi_reduction <add>, %534, %cst_158 [1] : vector<2x1xf32> to vector<2xf32>
    %536 = vector.shape_cast %535 : vector<2xf32> to vector<2x1xf32>
    %537 = math.log %536 : vector<2x1xf32>
    %538 = arith.addf %537, %532 : vector<2x1xf32>
    %539 = arith.subf %530, %538 : vector<2x1xf32>
    %540 = tpu.concatenate %84, %149, %214, %279, %344, %409, %474, %539 in 1 : vector<2x1xf32>, vector<2x1xf32>, vector<2x1xf32>, vector<2x1xf32>, vector<2x1xf32>, vector<2x1xf32>, vector<2x1xf32>, vector<2x1xf32> -> vector<2x8xf32>
    %c0_159 = arith.constant 0 : index
    %c0_160 = arith.constant 0 : index
    %541 = vector.load %arg11[%c0_159, %c0_160] : memref<2x8xf32, #tpu.memory_space<vmem>>, vector<2x8xf32>
    tpu.vector_store %arg11[%c0_159, %c0_160], %540 {strides = array<i32>} : memref<2x8xf32, #tpu.memory_space<vmem>>, vector<2x8xf32>,
    return
  }
}

</mosaic_0001>

<bundles_post_ra>
// kernel: tpu_custom_call.1
= control target key start
LH: loop header
LB: loop body
LE: loop exit
PB: predicated region body
PF: predicated region fallthrough
CT: control target
= control target key end

     0   :  { %s6502_s0 = inlined_call_operand.vmem [shape: f32[8,16,4], index: 0, kind: input, shape index: {}]   ;;  %s6503_s1 = inlined_call_operand.vmem [shape: f32[16,16], index: 1, kind: input, shape index: {}]   ;;  %s6504_s2 = inlined_call_operand.vmem [shape: f32[2,16], index: 2, kind: input, shape index: {}]   ;;  %s6505_s3 = inlined_call_operand.vmem [shape: f32[4,16], index: 3, kind: input, shape index: {}]   ;;  %s6506_s4 = inlined_call_operand.vmem [shape: f32[1,16], index: 4, kind: input, shape index: {}]   ;;  %s6507_s5 = inlined_call_operand.vmem [shape: f32[48,128], index: 5, kind: input, shape index: {}]   ;;  %s6508_s6 = inlined_call_operand.vmem [shape: f32[1,128], index: 6, kind: input, shape index: {}]   ;;  %s6509_s7 = inlined_call_operand.vmem [shape: f32[64,128], index: 7, kind: input, shape index: {}]   ;;  %s6510_s8 = inlined_call_operand.vmem [shape: f32[1,128], index: 8, kind: input, shape index: {}]   ;;  %s6511_s9 = inlined_call_operand.vmem [shape: f32[32,1], index: 9, kind: input, shape index: {}]   ;;  %s6512_s10 = inlined_call_operand.<no memory space> [shape: f32[1,1], index: 10, kind: input, shape index: {}]   ;;  %s6513_s11 = inlined_call_operand.hbm [shape: f32[2,8], index: 11, kind: output, shape index: {}]  }
   0x1   :  { %v16_v0 = vstv %s6512_s10 }
   0x2   :  { %17 = vst [vmem:[#allocation2] sm:$0x1] %v16_v0 }
   0x3   :  { %v72_v1 = vld [vmem:[%s6502_s0] sm:$0xff]  ;;  %v73_v2 = vld [vmem:[%s6502_s0 + $0x8] sm:$0xff]  ;;  %vm74_vm0 = vcmask 130048  }
   0x4   :  { %v5657_v3 = vld [vmem:[%s6503_s1] sm:$0xff]  ;;  %v5158_v4 = vpack.c.bf16 %v73_v2, %v72_v1 }
   0x5   :  { %4650 = vmatprep.mubr.msk.f32.mxu0 %vm74_vm0, %v5657_v3 }
   0x6   :  { %18 = vsyncpa [#allocation4], 0  ;;  %5159 = vmatprep.subr.bf16.mxu0 %v5158_v4  ;;  %v5664_v5 = vld [vmem:[%s6503_s1 + $0x8] sm:$0xff]  ;;  %v5671_v6 = vld [vmem:[%s6505_s3] sm:$0xf]  ;;  %vm169_vm1 = vcmask 1043456   ;;  %v67_v32 = vlaneseq }
   0x7   :  { %5161 = vmatpush3.bf16.msra.mxu0 %v5158_v4  ;;  %4653 = vmatprep.subr.msk.mxu1 %vm169_vm1, %v5671_v6  ;;  %vm162_vm2 = vcmask 31744   ;;  %v5571_v9 = vmov 0.0|0.0   ;;  %vm5572_vm3 = vmmov 0   ;;  %v5573_v10 = vmov 0.0   ;;  %v46_v11 = vld [vmem:[%s6507_s5] sm:$0xff]  ;;  %v47_v12 = vld [vmem:[%s6507_s5 + $0x8] sm:$0xff] }
   0x8   :  { %4654 = vmatpush3.msk.msra.mxu1 %vm169_vm1, %v5671_v6  ;;  %5165 = vmatprep.subr.bf16.mxu0 %v5571_v9  ;;  %v48_v13 = vld [vmem:[%s6507_s5 + $0x10] sm:$0xff]  ;;  %v5694_v14 = vpack.c.bf16 %v47_v12, %v46_v11  ;;  %v49_v15 = vld [vmem:[%s6507_s5 + $0x18] sm:$0xff]  ;;  %v50_v17 = vld [vmem:[%s6507_s5 + $0x20] sm:$0xff]  ;;  %vm330_vm4 = vcmask 392192   ;;  %v68_v33 = vand.u32 127, %v67_v32  ;;  %s5574_s25 = smov 64  }
   0x9   :  { %5162 = vmatprep.subr.bf16.mxu1 %v5571_v9  ;;  %v5700_v16 = vpack.c.bf16 %v49_v15, %v48_v13  ;;  %v51_v18 = vld [vmem:[%s6507_s5 + $0x28] sm:$0xff]  ;;  %v5718_v20 = vld [vmem:[%s6506_s4] ss:$0 sm:$0xff]  ;;  %s5575_s26 = smov 32   ;;  %v54_v52 = vld [vmem:[%s6509_s7 + $0x10] sm:$0xff]  ;;  %vm431_vm8 = vcmask 261120  }
   0xa   :  { %4651 = vmatmul.mubr.msk.f32.vlgmr.msra.gmra.mrb[0].mxu0 %vm74_vm0, %v5664_v5  ;;  %v5710_v19 = vpack.c.bf16 %v51_v18, %v50_v17  ;;  %v5725_v28 = vld [vmem:[%s6504_s2] sm:$0x3]  ;;  %vm69_vm5 = vcmp.ge.s32.totalorder %v68_v33, 64  ;;  %vm70_vm6 = vcmp.lt.s32.totalorder %v68_v33, 96  ;;  %v53_v51 = vld [vmem:[%s6509_s7 + $0x8] sm:$0xff]  ;;  %v55_v54 = vld [vmem:[%s6509_s7 + $0x18] sm:$0xff] }
   0xb   :  { %4677 = vmatprep.mubr.msk.f32.mxu0 %vm5572_vm3, %v5573_v10  ;;  %5167 = vmatpush3.bf16.msra.mxu0 %v5694_v14  ;;  %v5739_v34 = vld [vmem:[%s6508_s6] ss:$0 sm:$0xff]  ;;  %vm5742_vm7 = vmand %vm69_vm5, %vm70_vm6  ;;  %v5770_v55 = vpack.c.bf16 %v55_v54, %v54_v52  ;;  %v57_v57 = vld [vmem:[%s6509_s7 + $0x28] sm:$0xff]  ;;  %vm439_vm9 = vcmask 523264   ;;  %s5576_s18 = smov 48   ;;  %s5579_s29 = smov 5  }
   0xc   :  { %5168 = vmatprep.subr.bf16.mxu0 %v5571_v9  ;;  %v52_v50 = vld [vmem:[%s6509_s7] sm:$0xff]  ;;  %v58_v59 = vld [vmem:[%s6509_s7 + $0x30] sm:$0xff]  ;;  %v59_v60 = vld [vmem:[%s6509_s7 + $0x38] sm:$0xff]  ;;  %s5581_s30 = smov 4   ;;  %vm4279_vm10 = vcmask 7168   ;;  %vm4281_vm11 = vcmask 15360  }
   0xd   :  { %v5764_v53 = vpack.c.bf16 %v53_v51, %v52_v50  ;;  %v56_v56 = vld [vmem:[%s6509_s7 + $0x20] sm:$0xff]  ;;  %v5791_v62 = vpack.c.bf16 %v59_v60, %v58_v59  ;;  %v63_v32 = vld [vmem:[%s6511_s9 + $0x8] sm:$0xff]  ;;  %v64_v33 = vld [vmem:[%s6511_s9 + $0x10] sm:$0xff]  ;;  %vm4283_vm12 = vcmask 23552   ;;  %vm4286_vm13 = vcmask 39936   ;;  %s5584_s12 = smov [#allocation3]  }
   0xe   :  { %v5780_v58 = vpack.c.bf16 %v57_v57, %v56_v56  ;;  %v5803_v4 = vld [vmem:[%s6510_s8] ss:$0 sm:$0xff]  ;;  %vm4288_vm14 = vcmask 48128   ;;  %s4300_s13 = sshll.u32 %s5584_s12, 4  ;;  %vm4290_vm15 = vcmask 56320   ;;  %s4301_s13 = int_to_ptr.vmem [resolvable:$true] %s4300_s13 }
   0xf   :  { %5170 = vmatpush3.bf16.msra.mxu0 %v5700_v16  ;;  %s5547_s14 = scalar_lea.vmem %s4301_s13, 32  ;;  %p5552_p1 = scmp.lt.s32.totalorder %s4301_s13, %s4301_s13 }
  0x10   :  { %5171 = vmatprep.subr.bf16.mxu0 %v5571_v9  ;;  %p5548_p0 = scmp.ne.s32.totalorder %s4301_s13, %s5547_s14  ;;  %p5553_p2 = scmp.lt.s32.totalorder %s5547_s14, %s5547_s14 }
  0x12   :  { %p5554_p3 = por %p5553_p2, %p5552_p1 }
  0x13   :  { %5173 = vmatpush3.bf16.msra.mxu0 %v5710_v19 }
  0x14   :  { %5186 = vmatprep.subr.bf16.mxu0 %v5571_v9  ;;  %p5555_p4 = pnand %p5554_p3, %p5548_p0 }
  0xdd   :  { %v4652_v7 = vpop.f32.mrb[0].mxu0 }
  0xde   :  { %v147_v8 = vpop.f32.mrb[1].mxu0 }
  0xdf   :  { %4655 = vmatprep.mubr.msk.f32.mxu1 %vm162_vm2, %v147_v8 }
  0xe0   :  { %4656 = vmatmul.mubr.msk.f32.vlgmr.msra.gmra.mrb[0].mxu1 %vm162_vm2, %v4652_v7 }
  0xe1   :  { %4662 = vmatprep.mubr.msk.f32.mxu1 %vm5572_vm3, %v5573_v10 }
 0x1b3   :  { %v4657_v21 = vpop.f32.mrb[0].mxu1 }
 0x1b4   :  { %v245_v22 = vadd.f32 %v4657_v21, %v5718_v20  ;;  %v239_v23 = vpop.f32.mrb[1].mxu1 }
 0x1b5   :  { %v240_v24 = vadd.f32 %v5718_v20, %v239_v23 }
 0x1b6   :  { %v249_v25 = vmax.f32 %v245_v22, 0.0 }
 0x1b7   :  { %v248_v26 = vmax.f32 %v240_v24, 0.0  ;;  %v4321_v24 = vld [vmem:[%s6502_s0 + $0x10] sm:$0xff] }
 0x1b9   :  { %v5163_v27 = vpack.c.bf16 %v249_v25, %v248_v26  ;;  %v4322_v25 = vld [vmem:[%s6502_s0 + $0x18] sm:$0xff] }
 0x1ba   :  { %v5192_v26 = vpack.c.bf16 %v4322_v25, %v4321_v24 }
 0x1bb   :  { %5164 = vmatpush3.bf16.msra.mxu1 %v5163_v27 }
 0x1bc   :  { %5174 = vmatprep.subr.bf16.mxu1 %v5571_v9 }
 0x1be   :  { %4663 = vmatmul.mubr.msk.f32.vlgmr.msra.gmra.mrb[2].mxu1 %vm74_vm0, %v5725_v28 }
 0x1bf   :  { %4696 = vmatprep.mubr.msk.f32.mxu1 %vm5572_vm3, %v5573_v10  ;;  %5176 = vmatpush3.bf16.msra.mxu1 %v5764_v53 }
 0x1c0   :  { %5177 = vmatprep.subr.bf16.mxu1 %v5571_v9 }
 0x1c3   :  { %5179 = vmatpush3.bf16.msra.mxu1 %v5770_v55 }
 0x1c4   :  { %5180 = vmatprep.subr.bf16.mxu1 %v5571_v9 }
 0x1c7   :  { %5182 = vmatpush3.bf16.msra.mxu1 %v5780_v58 }
 0x1c8   :  { %5183 = vmatprep.subr.bf16.mxu1 %v5571_v9 }
 0x1cb   :  { %5185 = vmatpush3.bf16.msra.mxu1 %v5791_v62 }
 0x1cc   :  { %5193 = vmatprep.subr.bf16.mxu1 %v5192_v26 }
 0x291   :  { %v319_v29 = vpop.f32.mrb[2].mxu1 }
 0x292   :  { %v323_v30 = vsel %vm74_vm0, %v319_v29, 0.0  ;;  %v4664_v31 = vpop.f32.mrb[3].mxu1 }
 0x293   :  { %4678 = vmatmul.mubr.msk.f32.vlgmr.msra.gmra.mrb[2].mxu0 %vm330_vm4, %v323_v30  ;;  %v62_v31 = vld [vmem:[%s6511_s9] sm:$0xff] }
 0x294   :  { %4707 = vmatprep.mubr.msk.f32.mxu0 %vm5572_vm3, %v5573_v10 }
 0x366   :  { %v400_v35 = vpop.f32.mrb[2].mxu0 }
 0x367   :  { %v401_v36 = vadd.f32 %v5739_v34, %v400_v35  ;;  %v4679_v37 = vpop.f32.mrb[3].mxu0  ;;  %v5835_v35 = vpack.c.bf16 %v63_v32, %v62_v31 }
 0x369   :  { %v404_v39 = vmul.f32 0.5, %v401_v36  ;;  %5188 = vmatpush3.bf16.msra.mxu0 %v5835_v35 }
 0x36a   :  { %5189 = vmatprep.subr.bf16.mxu0 %v5571_v9 }
 0x36b   :  { %v405_v40 = vsel %vm5742_vm7, %v401_v36, %v404_v39  ;;  %v65_v36 = vld [vmem:[%s6511_s9 + $0x18] sm:$0xff] }
 0x36c   :  { %5444 = vtanh.f32 %v405_v40  ;;  %v5841_v37 = vpack.c.bf16 %v65_v36, %v64_v33 }
 0x36e   :  { %5191 = vmatpush3.bf16.msra.mxu0 %v5841_v37 }
 0x36f   :  { %4717 = vmatprep.subr.msk.mxu0 %vm169_vm1, %v5671_v6 }
 0x376   :  { %v5445_v41 = vpop.eup %5444 }
 0x377   :  { %v407_v42 = vmul.f32 0.5, %v5445_v41 }
 0x379   :  { %v408_v43 = vadd.f32 0.5, %v407_v42 }
 0x37b   :  { %v409_v44 = vsel %vm5742_vm7, %v5445_v41, %v408_v43 }
 0x37c   :  { %412 = vrot.lane.b32.xlu0 %v409_v44, %s5574_s25  ;;  %v410_v47 = vmul.f32 0.0, %v409_v44 }
 0x3ee   :  { %v413_v45 = vpop.permute.xlu0 %412 }
 0x3ef   :  { %v415_v46 = vmul.f32 %v413_v45, %v409_v44 }
 0x3f1   :  { %417 = vrot.lane.b32.xlu0 %v415_v46, %s5575_s26 }
 0x463   :  { %v418_v48 = vpop.permute.xlu0 %417 }
 0x464   :  { %v5752_v49 = vadd.f32 %v418_v48, %v410_v47 }
 0x466   :  { %5446 = vtanh.f32 %v5752_v49 }
 0x470   :  { %v5447_v61 = vpop.eup %5446 }
 0x471   :  { %423 = vrot.lane.b32.xlu1 %v5447_v61, %s5574_s25 }
 0x4e3   :  { %v424_v63 = vpop.permute.xlu1 %423 }
 0x4e4   :  { %v426_v0 = vmul.f32 %v424_v63, %v409_v44 }
 0x4e6   :  { %428 = vrot.lane.b32.xlu1 %v426_v0, %s5575_s26 }
 0x558   :  { %v429_v1 = vpop.permute.xlu1 %428 }
 0x559   :  { %v432_v2 = vsel %vm431_vm8, %v429_v1, 0.0 }
 0x55a   :  { %4697 = vmatmul.mubr.msk.f32.vlgmr.msra.gmra.mrb[4].mxu1 %vm439_vm9, %v432_v2 }
 0x55b   :  { %4714 = vmatprep.mubr.msk.f32.mxu1 %vm74_vm0, %v5657_v3  ;;  %5195 = vmatpush3.bf16.msra.mxu1 %v5192_v26 }
 0x55c   :  { %5196 = vmatprep.subr.bf16.mxu1 %v5571_v9 }
 0x55e   :  { %4715 = vmatmul.mubr.msk.f32.vlgmr.msra.gmra.mrb[6].mxu1 %vm74_vm0, %v5664_v5 }
 0x55f   :  { %4726 = vmatprep.mubr.msk.f32.mxu1 %vm5572_vm3, %v5573_v10 }
 0x62d   :  { %v509_v7 = vpop.f32.mrb[4].mxu1 }
 0x62e   :  { %v510_v8 = vadd.f32 %v5803_v4, %v509_v7  ;;  %v4698_v11 = vpop.f32.mrb[5].mxu1 }
 0x630   :  { %v513_v12 = vmul.f32 0.5, %v510_v8 }
 0x631   :  { %v4716_v40 = vpop.f32.mrb[6].mxu1 }
 0x632   :  { %v514_v13 = vsel %vm5742_vm7, %v510_v8, %v513_v12  ;;  %v694_v41 = vpop.f32.mrb[7].mxu1 }
 0x633   :  { %5448 = vtanh.f32 %v514_v13 }
 0x63d   :  { %v5449_v15 = vpop.eup %5448 }
 0x63e   :  { %v516_v17 = vmul.f32 0.5, %v5449_v15 }
 0x640   :  { %v517_v18 = vadd.f32 0.5, %v516_v17 }
 0x642   :  { %v518_v21 = vsel %vm5742_vm7, %v5449_v15, %v517_v18 }
 0x643   :  { %521 = vrot.lane.b32.xlu0 %v518_v21, %s5574_s25  ;;  %v519_v27 = vmul.f32 0.0, %v518_v21 }
 0x6b5   :  { %v522_v22 = vpop.permute.xlu0 %521 }
 0x6b6   :  { %v524_v23 = vmul.f32 %v522_v22, %v518_v21 }
 0x6b8   :  { %526 = vrot.lane.b32.xlu1 %v524_v23, %s5575_s26 }
 0x72a   :  { %v527_v29 = vpop.permute.xlu1 %526 }
 0x72b   :  { %v5823_v30 = vadd.f32 %v527_v29, %v519_v27 }
 0x72d   :  { %5450 = vtanh.f32 %v5823_v30 }
 0x737   :  { %v5451_v39 = vpop.eup %5450 }
 0x738   :  { %532 = vrot.lane.b32.xlu0 %v5451_v39, %s5574_s25 }
 0x73c   :  { %856 = vrot.lane.b32.xlu0 %v426_v0, %s5576_s18 }
 0x7aa   :  { %v533_v42 = vpop.permute.xlu0 %532 }
 0x7ab   :  { %v5849_v43 = vmul.f32 %v533_v42, %v518_v21 }
 0x7ad   :  { %543 = vrot.lane.b32.xlu1 %v5849_v43, %s5575_s26 }
 0x7ae   :  { %v857_v57 = vpop.permute.xlu0 %856 }
 0x81f   :  { %v544_v44 = vpop.permute.xlu1 %543 }
 0x820   :  { %4708 = vmatmul.mubr.msk.f32.vlgmr.msra.gmra.mrb[4].mxu0 %vm431_vm8, %v544_v44 }
 0x821   :  { %4718 = vmatpush3.msk.msra.mxu0 %vm169_vm1, %v5671_v6  ;;  %4719 = vmatprep.mubr.msk.f32.mxu0 %vm162_vm2, %v694_v41 }
 0x822   :  { %5199 = vmatprep.subr.bf16.mxu0 %v5571_v9 }
 0x824   :  { %4720 = vmatmul.mubr.msk.f32.vlgmr.msra.gmra.mrb[6].mxu0 %vm162_vm2, %v4716_v40 }
 0x825   :  { %5201 = vmatpush3.bf16.msra.mxu0 %v5694_v14  ;;  %4741 = vmatprep.mubr.msk.f32.mxu0 %vm5572_vm3, %v5573_v10 }
 0x826   :  { %5202 = vmatprep.subr.bf16.mxu0 %v5571_v9 }
 0x829   :  { %5204 = vmatpush3.bf16.msra.mxu0 %v5700_v16 }
 0x82a   :  { %5205 = vmatprep.subr.bf16.mxu0 %v5571_v9 }
 0x82d   :  { %5207 = vmatpush3.bf16.msra.mxu0 %v5710_v19 }
 0x82e   :  { %5220 = vmatprep.subr.bf16.mxu0 %v5571_v9 }
 0x8f3   :  { %v5867_v45 = vpop.f32.mrb[4].mxu0 }
 0x8f4   :  { %v4709_v46 = vpop.f32.mrb[5].mxu0 }
 0x8f5   :  { %v4332_v46 = vld [vmem:[%s6502_s0 + $0x20] sm:$0xff] }
 0x8f7   :  { %v4721_v47 = vpop.f32.mrb[6].mxu0 }
 0x8f8   :  { %v781_v48 = vadd.f32 %v4721_v47, %v5718_v20  ;;  %v775_v50 = vpop.f32.mrb[7].mxu0  ;;  %v4333_v47 = vld [vmem:[%s6502_s0 + $0x28] sm:$0xff] }
 0x8f9   :  { %v776_v51 = vadd.f32 %v5718_v20, %v775_v50 }
 0x8fa   :  { %v785_v52 = vmax.f32 %v781_v48, 0.0  ;;  %v5226_v48 = vpack.c.bf16 %v4333_v47, %v4332_v46 }
 0x8fb   :  { %v784_v54 = vmax.f32 %v776_v51, 0.0 }
 0x8fd   :  { %v5197_v56 = vpack.c.bf16 %v785_v52, %v784_v54 }
 0x8ff   :  { %5198 = vmatpush3.bf16.msra.mxu1 %v5197_v56 }
 0x900   :  { %5208 = vmatprep.subr.bf16.mxu1 %v5571_v9 }
 0x902   :  { %4727 = vmatmul.mubr.msk.f32.vlgmr.msra.gmra.mrb[8].mxu1 %vm74_vm0, %v5725_v28 }
 0x903   :  { %5210 = vmatpush3.bf16.msra.mxu1 %v5764_v53  ;;  %4760 = vmatprep.mubr.msk.f32.mxu1 %vm5572_vm3, %v5573_v10 }
 0x904   :  { %5211 = vmatprep.subr.bf16.mxu1 %v5571_v9 }
 0x907   :  { %5213 = vmatpush3.bf16.msra.mxu1 %v5770_v55 }
 0x908   :  { %5214 = vmatprep.subr.bf16.mxu1 %v5571_v9 }
 0x90b   :  { %5216 = vmatpush3.bf16.msra.mxu1 %v5780_v58 }
 0x90c   :  { %5217 = vmatprep.subr.bf16.mxu1 %v5571_v9 }
 0x90f   :  { %5219 = vmatpush3.bf16.msra.mxu1 %v5791_v62 }
 0x910   :  { %5227 = vmatprep.subr.bf16.mxu1 %v5226_v48 }
 0x9d5   :  { %v852_v59 = vpop.f32.mrb[8].mxu1 }
 0x9d6   :  { %v859_v60 = vsel %vm74_vm0, %v852_v59, %v857_v57  ;;  %v4728_v61 = vpop.f32.mrb[9].mxu1 }
 0x9d7   :  { %4742 = vmatmul.mubr.msk.f32.vlgmr.msra.gmra.mrb[8].mxu0 %vm330_vm4, %v859_v60 }
 0x9d8   :  { %5222 = vmatpush3.bf16.msra.mxu0 %v5835_v35  ;;  %4771 = vmatprep.mubr.msk.f32.mxu0 %vm5572_vm3, %v5573_v10 }
 0x9d9   :  { %5223 = vmatprep.subr.bf16.mxu0 %v5571_v9 }
 0x9dc   :  { %5225 = vmatpush3.bf16.msra.mxu0 %v5841_v37 }
 0x9dd   :  { %4781 = vmatprep.subr.msk.mxu0 %vm169_vm1, %v5671_v6 }
 0xaaa   :  { %v929_v63 = vpop.f32.mrb[8].mxu0 }
 0xaab   :  { %v930_v0 = vadd.f32 %v5739_v34, %v929_v63  ;;  %v4743_v1 = vpop.f32.mrb[9].mxu0 }
 0xaad   :  { %v933_v2 = vmul.f32 0.5, %v930_v0 }
 0xaaf   :  { %v934_v7 = vsel %vm5742_vm7, %v930_v0, %v933_v2 }
 0xab0   :  { %5452 = vtanh.f32 %v934_v7 }
 0xaba   :  { %v5453_v8 = vpop.eup %5452 }
 0xabb   :  { %v936_v11 = vmul.f32 0.5, %v5453_v8 }
 0xabd   :  { %v937_v12 = vadd.f32 0.5, %v936_v11 }
 0xabf   :  { %v938_v13 = vsel %vm5742_vm7, %v5453_v8, %v937_v12 }
 0xac0   :  { %941 = vrot.lane.b32.xlu1 %v938_v13, %s5574_s25  ;;  %v939_v18 = vmul.f32 %v938_v13, %v5752_v49 }
 0xb32   :  { %v942_v15 = vpop.permute.xlu1 %941 }
 0xb33   :  { %v944_v17 = vmul.f32 %v942_v15, %v938_v13 }
 0xb35   :  { %946 = vrot.lane.b32.xlu0 %v944_v17, %s5575_s26 }
 0xba7   :  { %v947_v21 = vpop.permute.xlu0 %946 }
 0xba8   :  { %v5900_v22 = vadd.f32 %v947_v21, %v939_v18 }
 0xbaa   :  { %5454 = vtanh.f32 %v5900_v22 }
 0xbb4   :  { %v5455_v23 = vpop.eup %5454 }
 0xbb5   :  { %952 = vrot.lane.b32.xlu1 %v5455_v23, %s5574_s25 }
 0xbb9   :  { %960 = vrot.lane.b32.xlu1 %v5849_v43, %s5574_s25 }
 0xc27   :  { %v953_v24 = vpop.permute.xlu1 %952 }
 0xc28   :  { %v955_v25 = vmul.f32 %v953_v24, %v938_v13 }
 0xc2a   :  { %957 = vrot.lane.b32.xlu0 %v955_v25, %s5575_s26 }
 0xc2b   :  { %v961_v26 = vpop.permute.xlu1 %960 }
 0xc9c   :  { %v958_v27 = vpop.permute.xlu0 %957 }
 0xc9d   :  { %v963_v29 = vsel %vm431_vm8, %v958_v27, %v961_v26 }
 0xc9e   :  { %4761 = vmatmul.mubr.msk.f32.vlgmr.msra.gmra.mrb[10].mxu1 %vm439_vm9, %v963_v29 }
 0xc9f   :  { %4778 = vmatprep.mubr.msk.f32.mxu1 %vm74_vm0, %v5657_v3  ;;  %5229 = vmatpush3.bf16.msra.mxu1 %v5226_v48 }
 0xca0   :  { %5230 = vmatprep.subr.bf16.mxu1 %v5571_v9 }
 0xca2   :  { %4779 = vmatmul.mubr.msk.f32.vlgmr.msra.gmra.mrb[12].mxu1 %vm74_vm0, %v5664_v5 }
 0xca3   :  { %4790 = vmatprep.mubr.msk.f32.mxu1 %vm5572_vm3, %v5573_v10 }
 0xd71   :  { %v1033_v49 = vpop.f32.mrb[10].mxu1 }
 0xd72   :  { %v1034_v31 = vadd.f32 %v5803_v4, %v1033_v49  ;;  %v4762_v32 = vpop.f32.mrb[11].mxu1 }
 0xd74   :  { %v1037_v33 = vmul.f32 0.5, %v1034_v31 }
 0xd75   :  { %v4780_v56 = vpop.f32.mrb[12].mxu1 }
 0xd76   :  { %v1038_v36 = vsel %vm5742_vm7, %v1034_v31, %v1037_v33  ;;  %v1212_v57 = vpop.f32.mrb[13].mxu1 }
 0xd77   :  { %5456 = vtanh.f32 %v1038_v36 }
 0xd81   :  { %v5457_v39 = vpop.eup %5456 }
 0xd82   :  { %v1040_v40 = vmul.f32 0.5, %v5457_v39 }
 0xd84   :  { %v1041_v41 = vadd.f32 0.5, %v1040_v40 }
 0xd86   :  { %v1042_v42 = vsel %vm5742_vm7, %v5457_v39, %v1041_v41 }
 0xd87   :  { %1045 = vrot.lane.b32.xlu0 %v1042_v42, %s5574_s25  ;;  %v1043_v50 = vmul.f32 %v1042_v42, %v5823_v30 }
 0xdf9   :  { %v1046_v43 = vpop.permute.xlu0 %1045 }
 0xdfa   :  { %v1048_v44 = vmul.f32 %v1046_v43, %v1042_v42 }
 0xdfc   :  { %1050 = vrot.lane.b32.xlu1 %v1048_v44, %s5575_s26 }
 0xe6e   :  { %v1051_v51 = vpop.permute.xlu1 %1050 }
 0xe6f   :  { %v5930_v52 = vadd.f32 %v1051_v51, %v1043_v50 }
 0xe71   :  { %5458 = vtanh.f32 %v5930_v52 }
 0xe7b   :  { %v5459_v54 = vpop.eup %5458 }
 0xe7c   :  { %1056 = vrot.lane.b32.xlu0 %v5459_v54, %s5574_s25 }
 0xe80   :  { %1374 = vrot.lane.b32.xlu0 %v955_v25, %s5576_s18 }
 0xeee   :  { %v1057_v59 = vpop.permute.xlu0 %1056 }
 0xeef   :  { %v5935_v60 = vmul.f32 %v1057_v59, %v1042_v42 }
 0xef1   :  { %1061 = vrot.lane.b32.xlu1 %v5935_v60, %s5575_s26 }
 0xef2   :  { %v1375_v13 = vpop.permute.xlu0 %1374 }
 0xf63   :  { %v1062_v61 = vpop.permute.xlu1 %1061 }
 0xf64   :  { %4772 = vmatmul.mubr.msk.f32.vlgmr.msra.gmra.mrb[10].mxu0 %vm431_vm8, %v1062_v61 }
 0xf65   :  { %4782 = vmatpush3.msk.msra.mxu0 %vm169_vm1, %v5671_v6  ;;  %4783 = vmatprep.mubr.msk.f32.mxu0 %vm162_vm2, %v1212_v57 }
 0xf66   :  { %5233 = vmatprep.subr.bf16.mxu0 %v5571_v9 }
 0xf68   :  { %4784 = vmatmul.mubr.msk.f32.vlgmr.msra.gmra.mrb[12].mxu0 %vm162_vm2, %v4780_v56 }
 0xf69   :  { %5235 = vmatpush3.bf16.msra.mxu0 %v5694_v14  ;;  %4805 = vmatprep.mubr.msk.f32.mxu0 %vm5572_vm3, %v5573_v10 }
 0xf6a   :  { %5236 = vmatprep.subr.bf16.mxu0 %v5571_v9 }
 0xf6d   :  { %5238 = vmatpush3.bf16.msra.mxu0 %v5700_v16 }
 0xf6e   :  { %5239 = vmatprep.subr.bf16.mxu0 %v5571_v9 }
 0xf71   :  { %5241 = vmatpush3.bf16.msra.mxu0 %v5710_v19 }
 0xf72   :  { %5254 = vmatprep.subr.bf16.mxu0 %v5571_v9 }
0x1037   :  { %v5953_v30 = vpop.f32.mrb[10].mxu0 }
0x1038   :  { %v4773_v63 = vpop.f32.mrb[11].mxu0 }
0x103b   :  { %v4785_v0 = vpop.f32.mrb[12].mxu0 }
0x103c   :  { %v1299_v1 = vadd.f32 %v4785_v0, %v5718_v20  ;;  %v1293_v2 = vpop.f32.mrb[13].mxu0  ;;  %v4343_v0 = vld [vmem:[%s6502_s0 + $0x30] sm:$0xff] }
0x103d   :  { %v1294_v7 = vadd.f32 %v5718_v20, %v1293_v2 }
0x103e   :  { %v1303_v8 = vmax.f32 %v1299_v1, 0.0  ;;  %v4344_v1 = vld [vmem:[%s6502_s0 + $0x38] sm:$0xff] }
0x103f   :  { %v1302_v11 = vmax.f32 %v1294_v7, 0.0  ;;  %v5260_v2 = vpack.c.bf16 %v4344_v1, %v4343_v0 }
0x1041   :  { %v5231_v12 = vpack.c.bf16 %v1303_v8, %v1302_v11 }
0x1043   :  { %5232 = vmatpush3.bf16.msra.mxu1 %v5231_v12 }
0x1044   :  { %5242 = vmatprep.subr.bf16.mxu1 %v5571_v9 }
0x1046   :  { %4791 = vmatmul.mubr.msk.f32.vlgmr.msra.gmra.mrb[14].mxu1 %vm74_vm0, %v5725_v28 }
0x1047   :  { %5244 = vmatpush3.bf16.msra.mxu1 %v5764_v53  ;;  %4824 = vmatprep.mubr.msk.f32.mxu1 %vm5572_vm3, %v5573_v10 }
0x1048   :  { %5245 = vmatprep.subr.bf16.mxu1 %v5571_v9 }
0x104b   :  { %5247 = vmatpush3.bf16.msra.mxu1 %v5770_v55 }
0x104c   :  { %5248 = vmatprep.subr.bf16.mxu1 %v5571_v9 }
0x104f   :  { %5250 = vmatpush3.bf16.msra.mxu1 %v5780_v58 }
0x1050   :  { %5251 = vmatprep.subr.bf16.mxu1 %v5571_v9 }
0x1053   :  { %5253 = vmatpush3.bf16.msra.mxu1 %v5791_v62 }
0x1054   :  { %5261 = vmatprep.subr.bf16.mxu1 %v5260_v2 }
0x1119   :  { %v1370_v15 = vpop.f32.mrb[14].mxu1 }
0x111a   :  { %v1377_v17 = vsel %vm74_vm0, %v1370_v15, %v1375_v13  ;;  %v4792_v18 = vpop.f32.mrb[15].mxu1 }
0x111b   :  { %4806 = vmatmul.mubr.msk.f32.vlgmr.msra.gmra.mrb[14].mxu0 %vm330_vm4, %v1377_v17 }
0x111c   :  { %5256 = vmatpush3.bf16.msra.mxu0 %v5835_v35  ;;  %4835 = vmatprep.mubr.msk.f32.mxu0 %vm5572_vm3, %v5573_v10 }
0x111d   :  { %5257 = vmatprep.subr.bf16.mxu0 %v5571_v9 }
0x1120   :  { %5259 = vmatpush3.bf16.msra.mxu0 %v5841_v37 }
0x1121   :  { %4845 = vmatprep.subr.msk.mxu0 %vm169_vm1, %v5671_v6 }
0x11ee   :  { %v1447_v21 = vpop.f32.mrb[14].mxu0 }
0x11ef   :  { %v1448_v23 = vadd.f32 %v5739_v34, %v1447_v21  ;;  %v4807_v24 = vpop.f32.mrb[15].mxu0 }
0x11f1   :  { %v1451_v25 = vmul.f32 0.5, %v1448_v23 }
0x11f3   :  { %v1452_v26 = vsel %vm5742_vm7, %v1448_v23, %v1451_v25 }
0x11f4   :  { %5460 = vtanh.f32 %v1452_v26 }
0x11fe   :  { %v5461_v27 = vpop.eup %5460 }
0x11ff   :  { %v1454_v29 = vmul.f32 0.5, %v5461_v27 }
0x1201   :  { %v1455_v49 = vadd.f32 0.5, %v1454_v29 }
0x1203   :  { %v1456_v31 = vsel %vm5742_vm7, %v5461_v27, %v1455_v49 }
0x1204   :  { %1459 = vrot.lane.b32.xlu1 %v1456_v31, %s5574_s25  ;;  %v1457_v36 = vmul.f32 %v1456_v31, %v5900_v22 }
0x1276   :  { %v1460_v32 = vpop.permute.xlu1 %1459 }
0x1277   :  { %v1462_v33 = vmul.f32 %v1460_v32, %v1456_v31 }
0x1279   :  { %1464 = vrot.lane.b32.xlu0 %v1462_v33, %s5575_s26 }
0x12eb   :  { %v1465_v39 = vpop.permute.xlu0 %1464 }
0x12ec   :  { %v5986_v40 = vadd.f32 %v1465_v39, %v1457_v36 }
0x12ee   :  { %5462 = vtanh.f32 %v5986_v40 }
0x12f8   :  { %v5463_v41 = vpop.eup %5462 }
0x12f9   :  { %1470 = vrot.lane.b32.xlu1 %v5463_v41, %s5574_s25 }
0x12fd   :  { %1478 = vrot.lane.b32.xlu1 %v5935_v60, %s5574_s25 }
0x136b   :  { %v1471_v42 = vpop.permute.xlu1 %1470 }
0x136c   :  { %v1473_v43 = vmul.f32 %v1471_v42, %v1456_v31 }
0x136e   :  { %1475 = vrot.lane.b32.xlu0 %v1473_v43, %s5575_s26 }
0x136f   :  { %v1479_v44 = vpop.permute.xlu1 %1478 }
0x13e0   :  { %v1476_v46 = vpop.permute.xlu0 %1475 }
0x13e1   :  { %v1481_v47 = vsel %vm431_vm8, %v1476_v46, %v1479_v44 }
0x13e2   :  { %4825 = vmatmul.mubr.msk.f32.vlgmr.msra.gmra.mrb[16].mxu1 %vm439_vm9, %v1481_v47 }
0x13e3   :  { %4842 = vmatprep.mubr.msk.f32.mxu1 %vm74_vm0, %v5657_v3  ;;  %5263 = vmatpush3.bf16.msra.mxu1 %v5260_v2 }
0x13e4   :  { %5264 = vmatprep.subr.bf16.mxu1 %v5571_v9 }
0x13e6   :  { %4843 = vmatmul.mubr.msk.f32.vlgmr.msra.gmra.mrb[18].mxu1 %vm74_vm0, %v5664_v5 }
0x13e7   :  { %4854 = vmatprep.mubr.msk.f32.mxu1 %vm5572_vm3, %v5573_v10 }
0x14b5   :  { %v1551_v22 = vpop.f32.mrb[16].mxu1 }
0x14b6   :  { %v1552_v48 = vadd.f32 %v5803_v4, %v1551_v22  ;;  %v4826_v50 = vpop.f32.mrb[17].mxu1 }
0x14b8   :  { %v1555_v51 = vmul.f32 0.5, %v1552_v48 }
0x14b9   :  { %v4844_v13 = vpop.f32.mrb[18].mxu1 }
0x14ba   :  { %v1556_v54 = vsel %vm5742_vm7, %v1552_v48, %v1555_v51  ;;  %v1730_v15 = vpop.f32.mrb[19].mxu1 }
0x14bb   :  { %5464 = vtanh.f32 %v1556_v54 }
0x14c5   :  { %v5465_v56 = vpop.eup %5464 }
0x14c6   :  { %v1558_v57 = vmul.f32 0.5, %v5465_v56 }
0x14c8   :  { %v1559_v59 = vadd.f32 0.5, %v1558_v57 }
0x14ca   :  { %v1560_v60 = vsel %vm5742_vm7, %v5465_v56, %v1559_v59 }
0x14cb   :  { %1563 = vrot.lane.b32.xlu0 %v1560_v60, %s5574_s25  ;;  %v1561_v7 = vmul.f32 %v1560_v60, %v5930_v52 }
0x153d   :  { %v1564_v61 = vpop.permute.xlu0 %1563 }
0x153e   :  { %v1566_v63 = vmul.f32 %v1564_v61, %v1560_v60 }
0x1540   :  { %1568 = vrot.lane.b32.xlu1 %v1566_v63, %s5575_s26 }
0x15b2   :  { %v1569_v8 = vpop.permute.xlu1 %1568 }
0x15b3   :  { %v6016_v11 = vadd.f32 %v1569_v8, %v1561_v7 }
0x15b5   :  { %5466 = vtanh.f32 %v6016_v11 }
0x15bf   :  { %v5467_v12 = vpop.eup %5466 }
0x15c0   :  { %1574 = vrot.lane.b32.xlu0 %v5467_v12, %s5574_s25 }
0x15c4   :  { %1892 = vrot.lane.b32.xlu0 %v1473_v43, %s5576_s18 }
0x1632   :  { %v1575_v17 = vpop.permute.xlu0 %1574 }
0x1633   :  { %v6021_v18 = vmul.f32 %v1575_v17, %v1560_v60 }
0x1635   :  { %1579 = vrot.lane.b32.xlu1 %v6021_v18, %s5575_s26 }
0x1636   :  { %v1893_v32 = vpop.permute.xlu0 %1892 }
0x16a7   :  { %v1580_v21 = vpop.permute.xlu1 %1579 }
0x16a8   :  { %4836 = vmatmul.mubr.msk.f32.vlgmr.msra.gmra.mrb[16].mxu0 %vm431_vm8, %v1580_v21 }
0x16a9   :  { %4846 = vmatpush3.msk.msra.mxu0 %vm169_vm1, %v5671_v6  ;;  %4847 = vmatprep.mubr.msk.f32.mxu0 %vm162_vm2, %v1730_v15 }
0x16aa   :  { %5267 = vmatprep.subr.bf16.mxu0 %v5571_v9 }
0x16ac   :  { %4848 = vmatmul.mubr.msk.f32.vlgmr.msra.gmra.mrb[18].mxu0 %vm162_vm2, %v4844_v13 }
0x16ad   :  { %5269 = vmatpush3.bf16.msra.mxu0 %v5694_v14  ;;  %4869 = vmatprep.mubr.msk.f32.mxu0 %vm5572_vm3, %v5573_v10 }
0x16ae   :  { %5270 = vmatprep.subr.bf16.mxu0 %v5571_v9 }
0x16b1   :  { %5272 = vmatpush3.bf16.msra.mxu0 %v5700_v16 }
0x16b2   :  { %5273 = vmatprep.subr.bf16.mxu0 %v5571_v9 }
0x16b5   :  { %5275 = vmatpush3.bf16.msra.mxu0 %v5710_v19 }
0x16b6   :  { %5288 = vmatprep.subr.bf16.mxu0 %v5571_v9 }
0x177b   :  { %v6039_v52 = vpop.f32.mrb[16].mxu0 }
0x177c   :  { %v4837_v23 = vpop.f32.mrb[17].mxu0 }
0x177f   :  { %v4849_v24 = vpop.f32.mrb[18].mxu0 }
0x1780   :  { %v1817_v25 = vadd.f32 %v4849_v24, %v5718_v20  ;;  %v1811_v26 = vpop.f32.mrb[19].mxu0 }
0x1781   :  { %v1812_v27 = vadd.f32 %v5718_v20, %v1811_v26 }
0x1782   :  { %v1821_v29 = vmax.f32 %v1817_v25, 0.0  ;;  %v4355_v25 = vld [vmem:[%s6502_s0 + $0x48] sm:$0xff] }
0x1783   :  { %v1820_v49 = vmax.f32 %v1812_v27, 0.0 }
0x1785   :  { %v5265_v31 = vpack.c.bf16 %v1821_v29, %v1820_v49 }
0x1787   :  { %5266 = vmatpush3.bf16.msra.mxu1 %v5265_v31 }
0x1788   :  { %5276 = vmatprep.subr.bf16.mxu1 %v5571_v9 }
0x178a   :  { %4855 = vmatmul.mubr.msk.f32.vlgmr.msra.gmra.mrb[20].mxu1 %vm74_vm0, %v5725_v28 }
0x178b   :  { %5278 = vmatpush3.bf16.msra.mxu1 %v5764_v53  ;;  %4888 = vmatprep.mubr.msk.f32.mxu1 %vm5572_vm3, %v5573_v10 }
0x178c   :  { %5279 = vmatprep.subr.bf16.mxu1 %v5571_v9 }
0x178f   :  { %5281 = vmatpush3.bf16.msra.mxu1 %v5770_v55 }
0x1790   :  { %5282 = vmatprep.subr.bf16.mxu1 %v5571_v9 }
0x1793   :  { %5284 = vmatpush3.bf16.msra.mxu1 %v5780_v58 }
0x1794   :  { %5285 = vmatprep.subr.bf16.mxu1 %v5571_v9 }
0x1797   :  { %5287 = vmatpush3.bf16.msra.mxu1 %v5791_v62 }
0x185d   :  { %v1888_v33 = vpop.f32.mrb[20].mxu1 }
0x185e   :  { %v1895_v36 = vsel %vm74_vm0, %v1888_v33, %v1893_v32  ;;  %v4856_v39 = vpop.f32.mrb[21].mxu1 }
0x185f   :  { %4870 = vmatmul.mubr.msk.f32.vlgmr.msra.gmra.mrb[20].mxu0 %vm330_vm4, %v1895_v36 }
0x1860   :  { %5290 = vmatpush3.bf16.msra.mxu0 %v5835_v35  ;;  %4899 = vmatprep.mubr.msk.f32.mxu0 %vm5572_vm3, %v5573_v10 }
0x1861   :  { %5291 = vmatprep.subr.bf16.mxu0 %v5571_v9 }
0x1864   :  { %5293 = vmatpush3.bf16.msra.mxu0 %v5841_v37 }
0x1865   :  { %4909 = vmatprep.subr.msk.mxu0 %vm169_vm1, %v5671_v6 }
0x1932   :  { %v1965_v41 = vpop.f32.mrb[20].mxu0 }
0x1933   :  { %v1966_v42 = vadd.f32 %v5739_v34, %v1965_v41  ;;  %v4871_v43 = vpop.f32.mrb[21].mxu0 }
0x1935   :  { %v1969_v44 = vmul.f32 0.5, %v1966_v42 }
0x1937   :  { %v1970_v46 = vsel %vm5742_vm7, %v1966_v42, %v1969_v44 }
0x1938   :  { %5468 = vtanh.f32 %v1970_v46 }
0x1942   :  { %v5469_v47 = vpop.eup %5468 }
0x1943   :  { %v1972_v22 = vmul.f32 0.5, %v5469_v47 }
0x1945   :  { %v1973_v48 = vadd.f32 0.5, %v1972_v22 }
0x1947   :  { %v1974_v50 = vsel %vm5742_vm7, %v5469_v47, %v1973_v48 }
0x1948   :  { %1977 = vrot.lane.b32.xlu1 %v1974_v50, %s5574_s25  ;;  %v1975_v56 = vmul.f32 %v1974_v50, %v5986_v40 }
0x19ba   :  { %v1978_v51 = vpop.permute.xlu1 %1977 }
0x19bb   :  { %v1980_v54 = vmul.f32 %v1978_v51, %v1974_v50  ;;  %v6151_v51 = vld [vmem:[%s6505_s3] sm:$0xf]  ;;  %s5582_s3 = smov 6  }
0x19bd   :  { %1982 = vrot.lane.b32.xlu0 %v1980_v54, %s5575_s26 }
0x1a2f   :  { %v1983_v57 = vpop.permute.xlu0 %1982 }
0x1a30   :  { %v6072_v59 = vadd.f32 %v1983_v57, %v1975_v56 }
0x1a32   :  { %5470 = vtanh.f32 %v6072_v59 }
0x1a3c   :  { %v5471_v60 = vpop.eup %5470 }
0x1a3d   :  { %1988 = vrot.lane.b32.xlu1 %v5471_v60, %s5574_s25 }
0x1a41   :  { %1996 = vrot.lane.b32.xlu1 %v6021_v18, %s5574_s25 }
0x1aaf   :  { %v1989_v61 = vpop.permute.xlu1 %1988 }
0x1ab0   :  { %v1991_v63 = vmul.f32 %v1989_v61, %v1974_v50 }
0x1ab2   :  { %1993 = vrot.lane.b32.xlu0 %v1991_v63, %s5575_s26 }
0x1ab3   :  { %v1997_v0 = vpop.permute.xlu1 %1996 }
0x1b24   :  { %v1994_v1 = vpop.permute.xlu0 %1993 }
0x1b25   :  { %v1999_v2 = vsel %vm431_vm8, %v1994_v1, %v1997_v0 }
0x1b26   :  { %4889 = vmatmul.mubr.msk.f32.vlgmr.msra.gmra.mrb[22].mxu1 %vm439_vm9, %v1999_v2 }
0x1b27   :  { %4906 = vmatprep.mubr.msk.f32.mxu1 %vm74_vm0, %v5657_v3  ;;  %v4354_v3 = vld [vmem:[%s6502_s0 + $0x40] sm:$0xff] }
0x1b28   :  { %v5294_v26 = vpack.c.bf16 %v4355_v25, %v4354_v3 }
0x1b2a   :  { %5295 = vmatprep.subr.bf16.mxu1 %v5294_v26 }
0x1b2b   :  { %5297 = vmatpush3.bf16.msra.mxu1 %v5294_v26 }
0x1b2c   :  { %5298 = vmatprep.subr.bf16.mxu1 %v5571_v9 }
0x1b2e   :  { %4907 = vmatmul.mubr.msk.f32.vlgmr.msra.gmra.mrb[24].mxu1 %vm74_vm0, %v5664_v5 }
0x1b2f   :  { %4918 = vmatprep.mubr.msk.f32.mxu1 %vm5572_vm3, %v5573_v10 }
0x1bf9   :  { %v2069_v40 = vpop.f32.mrb[22].mxu1 }
0x1bfa   :  { %v2070_v7 = vadd.f32 %v5803_v4, %v2069_v40  ;;  %v4890_v8 = vpop.f32.mrb[23].mxu1 }
0x1bfc   :  { %v2073_v12 = vmul.f32 0.5, %v2070_v7 }
0x1bfe   :  { %v2074_v13 = vsel %vm5742_vm7, %v2070_v7, %v2073_v12 }
0x1bff   :  { %5472 = vtanh.f32 %v2074_v13 }
0x1c01   :  { %v4908_v32 = vpop.f32.mrb[24].mxu1 }
0x1c02   :  { %v2248_v33 = vpop.f32.mrb[25].mxu1 }
0x1c09   :  { %v5473_v15 = vpop.eup %5472 }
0x1c0a   :  { %v2076_v17 = vmul.f32 0.5, %v5473_v15 }
0x1c0c   :  { %v2077_v18 = vadd.f32 0.5, %v2076_v17 }
0x1c0e   :  { %v2078_v21 = vsel %vm5742_vm7, %v5473_v15, %v2077_v18 }
0x1c0f   :  { %2081 = vrot.lane.b32.xlu0 %v2078_v21, %s5574_s25  ;;  %v2079_v27 = vmul.f32 %v2078_v21, %v6016_v11 }
0x1c81   :  { %v2082_v23 = vpop.permute.xlu0 %2081 }
0x1c82   :  { %v2084_v24 = vmul.f32 %v2082_v23, %v2078_v21 }
0x1c84   :  { %2086 = vrot.lane.b32.xlu1 %v2084_v24, %s5575_s26 }
0x1cf6   :  { %v2087_v29 = vpop.permute.xlu1 %2086 }
0x1cf7   :  { %v6102_v49 = vadd.f32 %v2087_v29, %v2079_v27 }
0x1cf9   :  { %5474 = vtanh.f32 %v6102_v49 }
0x1d03   :  { %v5475_v31 = vpop.eup %5474 }
0x1d04   :  { %2092 = vrot.lane.b32.xlu0 %v5475_v31, %s5574_s25 }
0x1d08   :  { %2410 = vrot.lane.b32.xlu0 %v1991_v63, %s5576_s18 }
0x1d76   :  { %v2093_v36 = vpop.permute.xlu0 %2092 }
0x1d77   :  { %v6107_v39 = vmul.f32 %v2093_v36, %v2078_v21 }
0x1d79   :  { %2097 = vrot.lane.b32.xlu1 %v6107_v39, %s5575_s26 }
0x1deb   :  { %v2098_v5 = vpop.permute.xlu1 %2097 }
0x1dec   :  { %4900 = vmatmul.mubr.msk.f32.vlgmr.msra.gmra.mrb[22].mxu0 %vm431_vm8, %v2098_v5  ;;  %v4366_v5 = vld [vmem:[%s6502_s0 + $0x58] sm:$0xff] }
0x1ded   :  { %4910 = vmatpush3.msk.msra.mxu0 %vm169_vm1, %v5671_v6  ;;  %4911 = vmatprep.mubr.msk.f32.mxu0 %vm162_vm2, %v2248_v33 }
0x1dee   :  { %5301 = vmatprep.subr.bf16.mxu0 %v5571_v9 }
0x1df0   :  { %4912 = vmatmul.mubr.msk.f32.vlgmr.msra.gmra.mrb[24].mxu0 %vm162_vm2, %v4908_v32 }
0x1df1   :  { %5303 = vmatpush3.bf16.msra.mxu0 %v5694_v14  ;;  %4933 = vmatprep.mubr.msk.f32.mxu0 %vm5572_vm3, %v5573_v10 }
0x1df2   :  { %5304 = vmatprep.subr.bf16.mxu0 %v5571_v9 }
0x1df5   :  { %5306 = vmatpush3.bf16.msra.mxu0 %v5700_v16 }
0x1df6   :  { %5307 = vmatprep.subr.bf16.mxu0 %v5571_v9 }
0x1df9   :  { %5309 = vmatpush3.bf16.msra.mxu0 %v5710_v19 }
0x1dfa   :  { %5322 = vmatprep.subr.bf16.mxu0 %v5571_v9 }
0x1ebf   :  { %v6125_v6 = vpop.f32.mrb[22].mxu0 }
0x1ec0   :  { %v4901_v11 = vpop.f32.mrb[23].mxu0 }
0x1ec3   :  { %v4913_v41 = vpop.f32.mrb[24].mxu0 }
0x1ec4   :  { %v2335_v42 = vadd.f32 %v4913_v41, %v5718_v20  ;;  %v2329_v43 = vpop.f32.mrb[25].mxu0  ;;  %v6196_v41 = vld [vmem:[%s6503_s1 + $0x8] sm:$0xff] }
0x1ec5   :  { %v2330_v44 = vadd.f32 %v5718_v20, %v2329_v43  ;;  %v2411_v20 = vpop.permute.xlu0 %2410 }
0x1ec6   :  { %v2339_v46 = vmax.f32 %v2335_v42, 0.0 }
0x1ec7   :  { %v2338_v47 = vmax.f32 %v2330_v44, 0.0 }
0x1ec9   :  { %v5299_v22 = vpack.c.bf16 %v2339_v46, %v2338_v47 }
0x1ecb   :  { %5300 = vmatpush3.bf16.msra.mxu1 %v5299_v22 }
0x1ecc   :  { %5310 = vmatprep.subr.bf16.mxu1 %v5571_v9 }
0x1ece   :  { %4919 = vmatmul.mubr.msk.f32.vlgmr.msra.gmra.mrb[26].mxu1 %vm74_vm0, %v5725_v28 }
0x1ecf   :  { %5312 = vmatpush3.bf16.msra.mxu1 %v5764_v53  ;;  %4952 = vmatprep.mubr.msk.f32.mxu1 %vm5572_vm3, %v5573_v10 }
0x1ed0   :  { %5313 = vmatprep.subr.bf16.mxu1 %v5571_v9 }
0x1ed3   :  { %5315 = vmatpush3.bf16.msra.mxu1 %v5770_v55 }
0x1ed4   :  { %5316 = vmatprep.subr.bf16.mxu1 %v5571_v9 }
0x1ed7   :  { %5318 = vmatpush3.bf16.msra.mxu1 %v5780_v58 }
0x1ed8   :  { %5319 = vmatprep.subr.bf16.mxu1 %v5571_v9 }
0x1edb   :  { %5321 = vmatpush3.bf16.msra.mxu1 %v5791_v62 }
0x1fa1   :  { %v2406_v48 = vpop.f32.mrb[26].mxu1 }
0x1fa2   :  { %v2413_v28 = vsel %vm74_vm0, %v2406_v48, %v2411_v20  ;;  %v4920_v50 = vpop.f32.mrb[27].mxu1 }
0x1fa3   :  { %4934 = vmatmul.mubr.msk.f32.vlgmr.msra.gmra.mrb[26].mxu0 %vm330_vm4, %v2413_v28 }
0x1fa4   :  { %5324 = vmatpush3.bf16.msra.mxu0 %v5835_v35  ;;  %4963 = vmatprep.mubr.msk.f32.mxu0 %vm5572_vm3, %v5573_v10 }
0x1fa5   :  { %5325 = vmatprep.subr.bf16.mxu0 %v5571_v9 }
0x1fa8   :  { %5327 = vmatpush3.bf16.msra.mxu0 %v5841_v37 }
0x1fa9   :  { %4973 = vmatprep.subr.msk.mxu0 %vm169_vm1, %v6151_v51 }
0x2076   :  { %v2483_v54 = vpop.f32.mrb[26].mxu0 }
0x2077   :  { %v2484_v56 = vadd.f32 %v5739_v34, %v2483_v54  ;;  %v4935_v57 = vpop.f32.mrb[27].mxu0 }
0x2079   :  { %v2487_v60 = vmul.f32 0.5, %v2484_v56 }
0x207b   :  { %v2488_v61 = vsel %vm5742_vm7, %v2484_v56, %v2487_v60  ;;  %v6231_v56 = vld [vmem:[%s6506_s4] ss:$0 sm:$0xff] }
0x207c   :  { %5476 = vtanh.f32 %v2488_v61 }
0x2086   :  { %v5477_v63 = vpop.eup %5476 }
0x2087   :  { %v2490_v0 = vmul.f32 0.5, %v5477_v63 }
0x2089   :  { %v2491_v1 = vadd.f32 0.5, %v2490_v0 }
0x208b   :  { %v2492_v2 = vsel %vm5742_vm7, %v5477_v63, %v2491_v1 }
0x208c   :  { %2495 = vrot.lane.b32.xlu1 %v2492_v2, %s5574_s25  ;;  %v2493_v34 = vmul.f32 %v2492_v2, %v6072_v59  ;;  %v6175_v59 = vld [vmem:[%s6503_s1] sm:$0xff] }
0x20fe   :  { %v2496_v40 = vpop.permute.xlu1 %2495 }
0x20ff   :  { %v2498_v7 = vmul.f32 %v2496_v40, %v2492_v2 }
0x2101   :  { %2500 = vrot.lane.b32.xlu0 %v2498_v7, %s5575_s26 }
0x2173   :  { %v2501_v8 = vpop.permute.xlu0 %2500 }
0x2174   :  { %v6163_v12 = vadd.f32 %v2501_v8, %v2493_v34 }
0x2176   :  { %5478 = vtanh.f32 %v6163_v12 }
0x2180   :  { %v5479_v13 = vpop.eup %5478 }
0x2181   :  { %2506 = vrot.lane.b32.xlu1 %v5479_v13, %s5574_s25 }
0x2185   :  { %2514 = vrot.lane.b32.xlu1 %v6107_v39, %s5574_s25 }
0x21f3   :  { %v2507_v15 = vpop.permute.xlu1 %2506 }
0x21f4   :  { %v2509_v17 = vmul.f32 %v2507_v15, %v2492_v2  ;;  %v6239_v2 = vld [vmem:[%s6504_s2] sm:$0x3] }
0x21f5   :  { %v6264_v15 = vld [vmem:[%s6508_s6] ss:$0 sm:$0xff] }
0x21f6   :  { %2511 = vrot.lane.b32.xlu0 %v2509_v17, %s5575_s26 }
0x21f7   :  { %v2515_v18 = vpop.permute.xlu1 %2514 }
0x2268   :  { %v2512_v21 = vpop.permute.xlu0 %2511 }
0x2269   :  { %v2517_v23 = vsel %vm431_vm8, %v2512_v21, %v2515_v18 }
0x226a   :  { %4953 = vmatmul.mubr.msk.f32.vlgmr.msra.gmra.mrb[28].mxu1 %vm439_vm9, %v2517_v23 }
0x226b   :  { %4970 = vmatprep.mubr.msk.f32.mxu1 %vm74_vm0, %v6175_v59 }
0x233d   :  { %v2587_v24 = vpop.f32.mrb[28].mxu1 }
0x233e   :  { %v2588_v3 = vadd.f32 %v5803_v4, %v2587_v24  ;;  %v4954_v25 = vpop.f32.mrb[29].mxu1  ;;  %v4365_v4 = vld [vmem:[%s6502_s0 + $0x50] sm:$0xff] }
0x233f   :  { %v5328_v11 = vpack.c.bf16 %v4366_v5, %v4365_v4 }
0x2340   :  { %v2591_v26 = vmul.f32 0.5, %v2588_v3 }
0x2341   :  { %5329 = vmatprep.subr.bf16.mxu1 %v5328_v11 }
0x2342   :  { %v2592_v27 = vsel %vm5742_vm7, %v2588_v3, %v2591_v26  ;;  %5331 = vmatpush3.bf16.msra.mxu1 %v5328_v11 }
0x2343   :  { %5480 = vtanh.f32 %v2592_v27  ;;  %5332 = vmatprep.subr.bf16.mxu1 %v5571_v9 }
0x2345   :  { %4971 = vmatmul.mubr.msk.f32.vlgmr.msra.gmra.mrb[30].mxu1 %vm74_vm0, %v6196_v41 }
0x2346   :  { %4982 = vmatprep.mubr.msk.f32.mxu1 %vm5572_vm3, %v5573_v10 }
0x234d   :  { %v5481_v29 = vpop.eup %5480 }
0x234e   :  { %v2594_v31 = vmul.f32 0.5, %v5481_v29 }
0x2350   :  { %v2595_v32 = vadd.f32 0.5, %v2594_v31 }
0x2352   :  { %v2596_v33 = vsel %vm5742_vm7, %v5481_v29, %v2595_v32 }
0x2353   :  { %2599 = vrot.lane.b32.xlu0 %v2596_v33, %s5574_s25  ;;  %v2597_v42 = vmul.f32 %v2596_v33, %v6102_v49 }
0x23c5   :  { %v2600_v36 = vpop.permute.xlu0 %2599 }
0x23c6   :  { %v2602_v39 = vmul.f32 %v2600_v36, %v2596_v33 }
0x23c8   :  { %2604 = vrot.lane.b32.xlu1 %v2602_v39, %s5575_s26 }
0x2418   :  { %v4972_v47 = vpop.f32.mrb[30].mxu1 }
0x2419   :  { %v2766_v22 = vpop.f32.mrb[31].mxu1 }
0x243a   :  { %v2605_v43 = vpop.permute.xlu1 %2604 }
0x243b   :  { %v6203_v44 = vadd.f32 %v2605_v43, %v2597_v42  ;;  %v6288_v43 = vld [vmem:[%s6510_s8] ss:$0 sm:$0xff] }
0x243d   :  { %5482 = vtanh.f32 %v6203_v44 }
0x2447   :  { %v5483_v46 = vpop.eup %5482 }
0x2448   :  { %2610 = vrot.lane.b32.xlu0 %v5483_v46, %s5574_s25 }
0x244c   :  { %2928 = vrot.lane.b32.xlu0 %v2509_v17, %s5576_s18 }
0x24ba   :  { %v2611_v20 = vpop.permute.xlu0 %2610 }
0x24bb   :  { %v6208_v48 = vmul.f32 %v2611_v20, %v2596_v33 }
0x24bd   :  { %2615 = vrot.lane.b32.xlu1 %v6208_v48, %s5575_s26 }
0x24be   :  { %v2929_v40 = vpop.permute.xlu0 %2928 }
0x252f   :  { %v2616_v28 = vpop.permute.xlu1 %2615 }
0x2530   :  { %4964 = vmatmul.mubr.msk.f32.vlgmr.msra.gmra.mrb[28].mxu0 %vm431_vm8, %v2616_v28 }
0x2531   :  { %4974 = vmatpush3.msk.msra.mxu0 %vm169_vm1, %v6151_v51  ;;  %4975 = vmatprep.mubr.msk.f32.mxu0 %vm162_vm2, %v2766_v22 }
0x2532   :  { %5335 = vmatprep.subr.bf16.mxu0 %v5571_v9 }
0x2534   :  { %4976 = vmatmul.mubr.msk.f32.vlgmr.msra.gmra.mrb[30].mxu0 %vm162_vm2, %v4972_v47 }
0x2535   :  { %5337 = vmatpush3.bf16.msra.mxu0 %v5694_v14  ;;  %4997 = vmatprep.mubr.msk.f32.mxu0 %vm5572_vm3, %v5573_v10 }
0x2536   :  { %5338 = vmatprep.subr.bf16.mxu0 %v5571_v9 }
0x2539   :  { %5340 = vmatpush3.bf16.msra.mxu0 %v5700_v16 }
0x253a   :  { %5341 = vmatprep.subr.bf16.mxu0 %v5571_v9 }
0x253d   :  { %5343 = vmatpush3.bf16.msra.mxu0 %v5710_v19 }
0x253e   :  { %5356 = vmatprep.subr.bf16.mxu0 %v5571_v9 }
0x2603   :  { %v6226_v49 = vpop.f32.mrb[28].mxu0 }
0x2604   :  { %v4965_v50 = vpop.f32.mrb[29].mxu0 }
0x2607   :  { %v4977_v54 = vpop.f32.mrb[30].mxu0 }
0x2608   :  { %v2853_v57 = vadd.f32 %v6231_v56, %v4977_v54  ;;  %v2847_v60 = vpop.f32.mrb[31].mxu0 }
0x2609   :  { %v2848_v61 = vadd.f32 %v6231_v56, %v2847_v60 }
0x260a   :  { %v2857_v63 = vmax.f32 %v2853_v57, 0.0 }
0x260b   :  { %v2856_v0 = vmax.f32 %v2848_v61, 0.0  ;;  %v4376_v61 = vld [vmem:[%s6502_s0 + $0x60] sm:$0xff] }
0x260d   :  { %v5333_v1 = vpack.c.bf16 %v2857_v63, %v2856_v0  ;;  %v4377_v63 = vld [vmem:[%s6502_s0 + $0x68] sm:$0xff] }
0x260e   :  { %v5362_v0 = vpack.c.bf16 %v4377_v63, %v4376_v61 }
0x260f   :  { %5334 = vmatpush3.bf16.msra.mxu1 %v5333_v1 }
0x2610   :  { %5344 = vmatprep.subr.bf16.mxu1 %v5571_v9 }
0x2612   :  { %4983 = vmatmul.mubr.msk.f32.vlgmr.msra.gmra.mrb[32].mxu1 %vm74_vm0, %v6239_v2 }
0x2613   :  { %5346 = vmatpush3.bf16.msra.mxu1 %v5764_v53  ;;  %5016 = vmatprep.mubr.msk.f32.mxu1 %vm5572_vm3, %v5573_v10 }
0x2614   :  { %5347 = vmatprep.subr.bf16.mxu1 %v5571_v9 }
0x2617   :  { %5349 = vmatpush3.bf16.msra.mxu1 %v5770_v55 }
0x2618   :  { %5350 = vmatprep.subr.bf16.mxu1 %v5571_v9 }
0x261b   :  { %5352 = vmatpush3.bf16.msra.mxu1 %v5780_v58 }
0x261c   :  { %5353 = vmatprep.subr.bf16.mxu1 %v5571_v9 }
0x261f   :  { %5355 = vmatpush3.bf16.msra.mxu1 %v5791_v62 }
0x2620   :  { %5363 = vmatprep.subr.bf16.mxu1 %v5362_v0 }
0x26e5   :  { %v2924_v7 = vpop.f32.mrb[32].mxu1 }
0x26e6   :  { %v2931_v34 = vsel %vm74_vm0, %v2924_v7, %v2929_v40  ;;  %v4984_v8 = vpop.f32.mrb[33].mxu1 }
0x26e7   :  { %4998 = vmatmul.mubr.msk.f32.vlgmr.msra.gmra.mrb[32].mxu0 %vm330_vm4, %v2931_v34 }
0x26e8   :  { %5358 = vmatpush3.bf16.msra.mxu0 %v5835_v35  ;;  %5027 = vmatprep.mubr.msk.f32.mxu0 %vm5572_vm3, %v5573_v10 }
0x26e9   :  { %5359 = vmatprep.subr.bf16.mxu0 %v5571_v9 }
0x26ec   :  { %5361 = vmatpush3.bf16.msra.mxu0 %v5841_v37 }
0x26ed   :  { %5037 = vmatprep.subr.msk.mxu0 %vm169_vm1, %v6151_v51 }
0x27ba   :  { %v3001_v13 = vpop.f32.mrb[32].mxu0 }
0x27bb   :  { %v3002_v17 = vadd.f32 %v6264_v15, %v3001_v13  ;;  %v4999_v18 = vpop.f32.mrb[33].mxu0 }
0x27bd   :  { %v3005_v21 = vmul.f32 0.5, %v3002_v17 }
0x27bf   :  { %v3006_v23 = vsel %vm5742_vm7, %v3002_v17, %v3005_v21 }
0x27c0   :  { %5484 = vtanh.f32 %v3006_v23 }
0x27ca   :  { %v5485_v24 = vpop.eup %5484 }
0x27cb   :  { %v3008_v3 = vmul.f32 0.5, %v5485_v24 }
0x27cd   :  { %v3009_v25 = vadd.f32 0.5, %v3008_v3 }
0x27cf   :  { %v3010_v26 = vsel %vm5742_vm7, %v5485_v24, %v3009_v25 }
0x27d0   :  { %3013 = vrot.lane.b32.xlu1 %v3010_v26, %s5574_s25  ;;  %v3011_v31 = vmul.f32 %v3010_v26, %v6163_v12 }
0x2842   :  { %v3014_v27 = vpop.permute.xlu1 %3013 }
0x2843   :  { %v3016_v29 = vmul.f32 %v3014_v27, %v3010_v26 }
0x2845   :  { %3018 = vrot.lane.b32.xlu0 %v3016_v29, %s5575_s26 }
0x28b7   :  { %v3019_v32 = vpop.permute.xlu0 %3018 }
0x28b8   :  { %v6274_v33 = vadd.f32 %v3019_v32, %v3011_v31 }
0x28ba   :  { %5486 = vtanh.f32 %v6274_v33 }
0x28c4   :  { %v5487_v36 = vpop.eup %5486 }
0x28c5   :  { %3024 = vrot.lane.b32.xlu1 %v5487_v36, %s5574_s25 }
0x28c9   :  { %3032 = vrot.lane.b32.xlu1 %v6208_v48, %s5574_s25 }
0x2937   :  { %v3025_v39 = vpop.permute.xlu1 %3024 }
0x2938   :  { %v3027_v4 = vmul.f32 %v3025_v39, %v3010_v26 }
0x293a   :  { %3029 = vrot.lane.b32.xlu0 %v3027_v4, %s5575_s26 }
0x293b   :  { %v3033_v5 = vpop.permute.xlu1 %3032 }
0x29ac   :  { %v3030_v11 = vpop.permute.xlu0 %3029 }
0x29ad   :  { %v3035_v42 = vsel %vm431_vm8, %v3030_v11, %v3033_v5 }
0x29ae   :  { %5017 = vmatmul.mubr.msk.f32.vlgmr.msra.gmra.mrb[34].mxu1 %vm439_vm9, %v3035_v42 }
0x29af   :  { %5034 = vmatprep.mubr.msk.f32.mxu1 %vm74_vm0, %v6175_v59  ;;  %5365 = vmatpush3.bf16.msra.mxu1 %v5362_v0 }
0x29b0   :  { %5366 = vmatprep.subr.bf16.mxu1 %v5571_v9 }
0x29b2   :  { %5035 = vmatmul.mubr.msk.f32.vlgmr.msra.gmra.mrb[36].mxu1 %vm74_vm0, %v6196_v41 }
0x29b3   :  { %5046 = vmatprep.mubr.msk.f32.mxu1 %vm5572_vm3, %v5573_v10 }
0x2a81   :  { %v3105_v12 = vpop.f32.mrb[34].mxu1 }
0x2a82   :  { %v3106_v46 = vadd.f32 %v6288_v43, %v3105_v12  ;;  %v5018_v47 = vpop.f32.mrb[35].mxu1 }
0x2a84   :  { %v3109_v22 = vmul.f32 0.5, %v3106_v46 }
0x2a85   :  { %v5036_v8 = vpop.f32.mrb[36].mxu1 }
0x2a86   :  { %v3110_v20 = vsel %vm5742_vm7, %v3106_v46, %v3109_v22  ;;  %v3284_v13 = vpop.f32.mrb[37].mxu1 }
0x2a87   :  { %5488 = vtanh.f32 %v3110_v20 }
0x2a91   :  { %v5489_v48 = vpop.eup %5488 }
0x2a92   :  { %v3112_v28 = vmul.f32 0.5, %v5489_v48 }
0x2a94   :  { %v3113_v50 = vadd.f32 0.5, %v3112_v28 }
0x2a96   :  { %v3114_v54 = vsel %vm5742_vm7, %v5489_v48, %v3113_v50 }
0x2a97   :  { %3117 = vrot.lane.b32.xlu0 %v3114_v54, %s5574_s25  ;;  %v3115_v1 = vmul.f32 %v3114_v54, %v6203_v44 }
0x2b09   :  { %v3118_v57 = vpop.permute.xlu0 %3117 }
0x2b0a   :  { %v3120_v60 = vmul.f32 %v3118_v57, %v3114_v54 }
0x2b0c   :  { %3122 = vrot.lane.b32.xlu1 %v3120_v60, %s5575_s26 }
0x2b7e   :  { %v3123_v40 = vpop.permute.xlu1 %3122 }
0x2b7f   :  { %v6309_v7 = vadd.f32 %v3123_v40, %v3115_v1 }
0x2b81   :  { %5490 = vtanh.f32 %v6309_v7 }
0x2b8b   :  { %v5491_v34 = vpop.eup %5490 }
0x2b8c   :  { %3128 = vrot.lane.b32.xlu0 %v5491_v34, %s5574_s25 }
0x2b90   :  { %3446 = vrot.lane.b32.xlu0 %v3027_v4, %s5576_s18 }
0x2bfe   :  { %v3129_v17 = vpop.permute.xlu0 %3128 }
0x2bff   :  { %v6314_v18 = vmul.f32 %v3129_v17, %v3114_v54 }
0x2c01   :  { %3133 = vrot.lane.b32.xlu1 %v6314_v18, %s5575_s26 }
0x2c02   :  { %v3447_v32 = vpop.permute.xlu0 %3446 }
0x2c73   :  { %v3134_v21 = vpop.permute.xlu1 %3133 }
0x2c74   :  { %5028 = vmatmul.mubr.msk.f32.vlgmr.msra.gmra.mrb[34].mxu0 %vm431_vm8, %v3134_v21 }
0x2c75   :  { %5038 = vmatpush3.msk.msra.mxu0 %vm169_vm1, %v6151_v51  ;;  %5039 = vmatprep.mubr.msk.f32.mxu0 %vm162_vm2, %v3284_v13 }
0x2c76   :  { %5369 = vmatprep.subr.bf16.mxu0 %v5571_v9 }
0x2c78   :  { %5040 = vmatmul.mubr.msk.f32.vlgmr.msra.gmra.mrb[36].mxu0 %vm162_vm2, %v5036_v8 }
0x2c79   :  { %5371 = vmatpush3.bf16.msra.mxu0 %v5694_v14  ;;  %5061 = vmatprep.mubr.msk.f32.mxu0 %vm5572_vm3, %v5573_v10 }
0x2c7a   :  { %5372 = vmatprep.subr.bf16.mxu0 %v5571_v9 }
0x2c7d   :  { %5374 = vmatpush3.bf16.msra.mxu0 %v5700_v16 }
0x2c7e   :  { %5375 = vmatprep.subr.bf16.mxu0 %v5571_v9 }
0x2c81   :  { %5377 = vmatpush3.bf16.msra.mxu0 %v5710_v19 }
0x2c82   :  { %5390 = vmatprep.subr.bf16.mxu0 %v5571_v9 }
0x2d47   :  { %v6332_v44 = vpop.f32.mrb[34].mxu0 }
0x2d48   :  { %v5029_v23 = vpop.f32.mrb[35].mxu0 }
0x2d4b   :  { %v5041_v24 = vpop.f32.mrb[36].mxu0 }
0x2d4c   :  { %v3371_v3 = vadd.f32 %v6231_v56, %v5041_v24  ;;  %v3365_v25 = vpop.f32.mrb[37].mxu0 }
0x2d4d   :  { %v3366_v26 = vadd.f32 %v6231_v56, %v3365_v25 }
0x2d4e   :  { %v3375_v27 = vmax.f32 %v3371_v3, 0.0 }
0x2d4f   :  { %v3374_v29 = vmax.f32 %v3366_v26, 0.0 }
0x2d51   :  { %v5367_v31 = vpack.c.bf16 %v3375_v27, %v3374_v29  ;;  %v4388_v27 = vld [vmem:[%s6502_s0 + $0x78] sm:$0xff] }
0x2d53   :  { %5368 = vmatpush3.bf16.msra.mxu1 %v5367_v31 }
0x2d54   :  { %5378 = vmatprep.subr.bf16.mxu1 %v5571_v9 }
0x2d56   :  { %5047 = vmatmul.mubr.msk.f32.vlgmr.msra.gmra.mrb[38].mxu1 %vm74_vm0, %v6239_v2 }
0x2d57   :  { %5380 = vmatpush3.bf16.msra.mxu1 %v5764_v53  ;;  %5080 = vmatprep.mubr.msk.f32.mxu1 %vm5572_vm3, %v5573_v10 }
0x2d58   :  { %5381 = vmatprep.subr.bf16.mxu1 %v5571_v9 }
0x2d5b   :  { %5383 = vmatpush3.bf16.msra.mxu1 %v5770_v55 }
0x2d5c   :  { %5384 = vmatprep.subr.bf16.mxu1 %v5571_v9 }
0x2d5f   :  { %5386 = vmatpush3.bf16.msra.mxu1 %v5780_v58 }
0x2d60   :  { %5387 = vmatprep.subr.bf16.mxu1 %v5571_v9 }
0x2d63   :  { %5389 = vmatpush3.bf16.msra.mxu1 %v5791_v62 }
0x2e29   :  { %v3442_v36 = vpop.f32.mrb[38].mxu1 }
0x2e2a   :  { %v3449_v39 = vsel %vm74_vm0, %v3442_v36, %v3447_v32  ;;  %v5048_v4 = vpop.f32.mrb[39].mxu1 }
0x2e2b   :  { %5062 = vmatmul.mubr.msk.f32.vlgmr.msra.gmra.mrb[38].mxu0 %vm330_vm4, %v3449_v39 }
0x2e2c   :  { %5392 = vmatpush3.bf16.msra.mxu0 %v5835_v35  ;;  %5091 = vmatprep.mubr.msk.f32.mxu0 %vm5572_vm3, %v5573_v10 }
0x2e2d   :  { %5393 = vmatprep.subr.bf16.mxu0 %v5571_v9 }
0x2e30   :  { %5395 = vmatpush3.bf16.msra.mxu0 %v5841_v37 }
0x2e31   :  { %5101 = vmatprep.subr.msk.mxu0 %vm169_vm1, %v6151_v51 }
0x2efe   :  { %v3519_v5 = vpop.f32.mrb[38].mxu0 }
0x2eff   :  { %v3520_v11 = vadd.f32 %v6264_v15, %v3519_v5  ;;  %v5063_v42 = vpop.f32.mrb[39].mxu0 }
0x2f01   :  { %v3523_v12 = vmul.f32 0.5, %v3520_v11 }
0x2f03   :  { %v3524_v46 = vsel %vm5742_vm7, %v3520_v11, %v3523_v12 }
0x2f04   :  { %5492 = vtanh.f32 %v3524_v46 }
0x2f0e   :  { %v5493_v47 = vpop.eup %5492 }
0x2f0f   :  { %v3526_v22 = vmul.f32 0.5, %v5493_v47 }
0x2f11   :  { %v3527_v20 = vadd.f32 0.5, %v3526_v22 }
0x2f13   :  { %v3528_v48 = vsel %vm5742_vm7, %v5493_v47, %v3527_v20 }
0x2f14   :  { %3531 = vrot.lane.b32.xlu1 %v3528_v48, %s5574_s25  ;;  %v3529_v54 = vmul.f32 %v3528_v48, %v6274_v33 }
0x2f86   :  { %v3532_v28 = vpop.permute.xlu1 %3531 }
0x2f87   :  { %v3534_v50 = vmul.f32 %v3532_v28, %v3528_v48 }
0x2f89   :  { %3536 = vrot.lane.b32.xlu0 %v3534_v50, %s5575_s26 }
0x2ffb   :  { %v3537_v57 = vpop.permute.xlu0 %3536 }
0x2ffc   :  { %v6365_v60 = vadd.f32 %v3537_v57, %v3529_v54 }
0x2ffe   :  { %5494 = vtanh.f32 %v6365_v60 }
0x3008   :  { %v5495_v61 = vpop.eup %5494 }
0x3009   :  { %3542 = vrot.lane.b32.xlu1 %v5495_v61, %s5574_s25 }
0x300d   :  { %3550 = vrot.lane.b32.xlu1 %v6314_v18, %s5574_s25 }
0x307b   :  { %v3543_v63 = vpop.permute.xlu1 %3542 }
0x307c   :  { %v3545_v0 = vmul.f32 %v3543_v63, %v3528_v48 }
0x307e   :  { %3547 = vrot.lane.b32.xlu0 %v3545_v0, %s5575_s26 }
0x307f   :  { %v3551_v1 = vpop.permute.xlu1 %3550 }
0x30f0   :  { %v3548_v40 = vpop.permute.xlu0 %3547 }
0x30f1   :  { %v3553_v34 = vsel %vm431_vm8, %v3548_v40, %v3551_v1 }
0x30f2   :  { %5081 = vmatmul.mubr.msk.f32.vlgmr.msra.gmra.mrb[40].mxu1 %vm439_vm9, %v3553_v34 }
0x30f3   :  { %5098 = vmatprep.mubr.msk.f32.mxu1 %vm74_vm0, %v6175_v59  ;;  %v4387_v59 = vld [vmem:[%s6502_s0 + $0x70] sm:$0xff]  ;;  %s5577_s0 = smov 1  }
0x30f4   :  { %v5396_v29 = vpack.c.bf16 %v4388_v27, %v4387_v59 }
0x30f6   :  { %5397 = vmatprep.subr.bf16.mxu1 %v5396_v29 }
0x30f7   :  { %5399 = vmatpush3.bf16.msra.mxu1 %v5396_v29 }
0x30f8   :  { %5400 = vmatprep.subr.bf16.mxu1 %v5571_v9 }
0x30fa   :  { %5099 = vmatmul.mubr.msk.f32.vlgmr.msra.gmra.mrb[42].mxu1 %vm74_vm0, %v6196_v41 }
0x30fb   :  { %5110 = vmatprep.mubr.msk.f32.mxu1 %vm5572_vm3, %v5573_v10 }
0x31c5   :  { %v3623_v33 = vpop.f32.mrb[40].mxu1 }
0x31c6   :  { %v3624_v8 = vadd.f32 %v6288_v43, %v3623_v33  ;;  %v5082_v13 = vpop.f32.mrb[41].mxu1 }
0x31c8   :  { %v3627_v17 = vmul.f32 0.5, %v3624_v8 }
0x31ca   :  { %v3628_v18 = vsel %vm5742_vm7, %v3624_v8, %v3627_v17 }
0x31cb   :  { %5496 = vtanh.f32 %v3628_v18 }
0x31cd   :  { %v5100_v4 = vpop.f32.mrb[42].mxu1 }
0x31ce   :  { %v3802_v5 = vpop.f32.mrb[43].mxu1 }
0x31d5   :  { %v5497_v21 = vpop.eup %5496 }
0x31d6   :  { %v3630_v23 = vmul.f32 0.5, %v5497_v21 }
0x31d8   :  { %v3631_v24 = vadd.f32 0.5, %v3630_v23 }
0x31da   :  { %v3632_v3 = vsel %vm5742_vm7, %v5497_v21, %v3631_v24 }
0x31db   :  { %3635 = vrot.lane.b32.xlu0 %v3632_v3, %s5574_s25  ;;  %v3633_v31 = vmul.f32 %v3632_v3, %v6309_v7 }
0x324d   :  { %v3636_v25 = vpop.permute.xlu0 %3635 }
0x324e   :  { %v3638_v26 = vmul.f32 %v3636_v25, %v3632_v3 }
0x3250   :  { %3640 = vrot.lane.b32.xlu1 %v3638_v26, %s5575_s26 }
0x32c2   :  { %v3641_v32 = vpop.permute.xlu1 %3640 }
0x32c3   :  { %v6395_v36 = vadd.f32 %v3641_v32, %v3633_v31 }
0x32c5   :  { %5498 = vtanh.f32 %v6395_v36 }
0x32cf   :  { %v5499_v39 = vpop.eup %5498 }
0x32d0   :  { %3646 = vrot.lane.b32.xlu0 %v5499_v39, %s5574_s25 }
0x32d4   :  { %3964 = vrot.lane.b32.xlu0 %v3545_v0, %s5576_s18  ;;  %s5578_s18 = smov 3  }
0x3342   :  { %v3647_v11 = vpop.permute.xlu0 %3646 }
0x3343   :  { %v6400_v42 = vmul.f32 %v3647_v11, %v3632_v3 }
0x3345   :  { %3651 = vrot.lane.b32.xlu1 %v6400_v42, %s5575_s26 }
0x33b7   :  { %v3652_v41 = vpop.permute.xlu1 %3651 }
0x33b8   :  { %5092 = vmatmul.mubr.msk.f32.vlgmr.msra.gmra.mrb[40].mxu0 %vm431_vm8, %v3652_v41 }
0x33b9   :  { %5102 = vmatpush3.msk.msra.mxu0 %vm169_vm1, %v6151_v51  ;;  %5103 = vmatprep.mubr.msk.f32.mxu0 %vm162_vm2, %v3802_v5 }
0x33ba   :  { %5403 = vmatprep.subr.bf16.mxu0 %v5571_v9 }
0x33bc   :  { %5104 = vmatmul.mubr.msk.f32.vlgmr.msra.gmra.mrb[42].mxu0 %vm162_vm2, %v5100_v4 }
0x33bd   :  { %5405 = vmatpush3.bf16.msra.mxu0 %v5694_v14  ;;  %5125 = vmatprep.mubr.msk.f32.mxu0 %vm5572_vm3, %v5573_v10 }
0x33be   :  { %5406 = vmatprep.subr.bf16.mxu0 %v5571_v9 }
0x33c1   :  { %5408 = vmatpush3.bf16.msra.mxu0 %v5700_v16  ;;  %v3965_v16 = vpop.permute.xlu0 %3964 }
0x33c2   :  { %5409 = vmatprep.subr.bf16.mxu0 %v5571_v9 }
0x33c5   :  { %5411 = vmatpush3.bf16.msra.mxu0 %v5710_v19 }
0x33c6   :  { %5424 = vmatprep.subr.bf16.mxu0 %v5571_v9 }
0x348b   :  { %v6418_v51 = vpop.f32.mrb[40].mxu0 }
0x348c   :  { %v5093_v7 = vpop.f32.mrb[41].mxu0 }
0x348f   :  { %v5105_v12 = vpop.f32.mrb[42].mxu0 }
0x3490   :  { %v3889_v46 = vadd.f32 %v6231_v56, %v5105_v12  ;;  %v3883_v14 = vpop.f32.mrb[43].mxu0 }
0x3491   :  { %v3884_v47 = vadd.f32 %v6231_v56, %v3883_v14 }
0x3492   :  { %v3893_v22 = vmax.f32 %v3889_v46, 0.0 }
0x3493   :  { %v3892_v20 = vmax.f32 %v3884_v47, 0.0 }
0x3495   :  { %v5401_v48 = vpack.c.bf16 %v3893_v22, %v3892_v20 }
0x3497   :  { %5402 = vmatpush3.bf16.msra.mxu1 %v5401_v48 }
0x3498   :  { %5412 = vmatprep.subr.bf16.mxu1 %v5571_v9 }
0x349a   :  { %5111 = vmatmul.mubr.msk.f32.vlgmr.msra.gmra.mrb[44].mxu1 %vm74_vm0, %v6239_v2 }
0x349b   :  { %5414 = vmatpush3.bf16.msra.mxu1 %v5764_v53  ;;  %5144 = vmatprep.mubr.msk.f32.mxu1 %vm5572_vm3, %v5573_v10 }
0x349c   :  { %5415 = vmatprep.subr.bf16.mxu1 %v5571_v9 }
0x349f   :  { %5417 = vmatpush3.bf16.msra.mxu1 %v5770_v55 }
0x34a0   :  { %5418 = vmatprep.subr.bf16.mxu1 %v5571_v9 }
0x34a3   :  { %5420 = vmatpush3.bf16.msra.mxu1 %v5780_v58 }
0x34a4   :  { %5421 = vmatprep.subr.bf16.mxu1 %v5571_v9 }
0x34a7   :  { %5423 = vmatpush3.bf16.msra.mxu1 %v5791_v62 }
0x356d   :  { %v3960_v19 = vpop.f32.mrb[44].mxu1 }
0x356e   :  { %v3967_v56 = vsel %vm74_vm0, %v3960_v19, %v3965_v16  ;;  %v5112_v53 = vpop.f32.mrb[45].mxu1  ;;  %vm4292_vm0 = vcmask 58368  }
0x356f   :  { %5126 = vmatmul.mubr.msk.f32.vlgmr.msra.gmra.mrb[44].mxu0 %vm330_vm4, %v3967_v56 }
0x3570   :  { %5426 = vmatpush3.bf16.msra.mxu0 %v5835_v35  ;;  %5155 = vmatprep.mubr.msk.f32.mxu0 %vm5572_vm3, %v5573_v10 }
0x3571   :  { %5427 = vmatprep.subr.bf16.mxu0 %v5571_v9 }
0x3574   :  { %5429 = vmatpush3.bf16.msra.mxu0 %v5841_v37 }
0x3642   :  { %v4037_v55 = vpop.f32.mrb[44].mxu0 }
0x3643   :  { %v4038_v58 = vadd.f32 %v6264_v15, %v4037_v55  ;;  %v5127_v62 = vpop.f32.mrb[45].mxu0 }
0x3645   :  { %v4041_v2 = vmul.f32 0.5, %v4038_v58 }
0x3647   :  { %v4042_v28 = vsel %vm5742_vm7, %v4038_v58, %v4041_v2 }
0x3648   :  { %5500 = vtanh.f32 %v4042_v28 }
0x3652   :  { %v5501_v50 = vpop.eup %5500 }
0x3653   :  { %v4044_v54 = vmul.f32 0.5, %v5501_v50 }
0x3655   :  { %v4045_v57 = vadd.f32 0.5, %v4044_v54 }
0x3657   :  { %v4046_v35 = vsel %vm5742_vm7, %v5501_v50, %v4045_v57 }
0x3658   :  { %4049 = vrot.lane.b32.xlu1 %v4046_v35, %s5574_s25  ;;  %v4047_v37 = vmul.f32 %v4046_v35, %v6365_v60 }
0x36ca   :  { %v4050_v9 = vpop.permute.xlu1 %4049 }
0x36cb   :  { %v4052_v10 = vmul.f32 %v4050_v9, %v4046_v35 }
0x36cd   :  { %4054 = vrot.lane.b32.xlu0 %v4052_v10, %s5575_s26 }
0x373f   :  { %v4055_v15 = vpop.permute.xlu0 %4054 }
0x3740   :  { %v4057_v61 = vadd.f32 %v4055_v15, %v4047_v37 }
0x3742   :  { %5502 = vtanh.f32 %v4057_v61 }
0x374c   :  { %v5503_v63 = vpop.eup %5502 }
0x374d   :  { %4060 = vrot.lane.b32.xlu1 %v5503_v63, %s5574_s25 }
0x3751   :  { %4068 = vrot.lane.b32.xlu1 %v6400_v42, %s5574_s25 }
0x37bf   :  { %v4061_v0 = vpop.permute.xlu1 %4060 }
0x37c0   :  { %v4063_v1 = vmul.f32 %v4061_v0, %v4046_v35 }
0x37c2   :  { %4065 = vrot.lane.b32.xlu0 %v4063_v1, %s5575_s26 }
0x37c3   :  { %v4069_v40 = vpop.permute.xlu1 %4068 }
0x3834   :  { %v4066_v34 = vpop.permute.xlu0 %4065 }
0x3835   :  { %v4071_v33 = vsel %vm431_vm8, %v4066_v34, %v4069_v40 }
0x3836   :  { %5145 = vmatmul.mubr.msk.f32.vlgmr.msra.gmra.mrb[46].mxu1 %vm439_vm9, %v4071_v33 }
0x3909   :  { %v4141_v60 = vpop.f32.mrb[46].mxu1 }
0x390a   :  { %v4142_v8 = vadd.f32 %v6288_v43, %v4141_v60  ;;  %v5146_v13 = vpop.f32.mrb[47].mxu1  ;;  %v6466_v43 = vld [vmem:[#allocation2] ss:$0 sm:$0xff] }
0x390b   :  { %v1132_v59 = vadd.f32 %v6466_v43, %v5953_v30  ;;  %v2168_v29 = vadd.f32 %v6466_v43, %v6125_v6  ;;  %v3204_v38 = vadd.f32 %v6466_v43, %v6332_v44  ;;  %v1650_v55 = vadd.f32 %v6466_v43, %v6039_v52 }
0x390c   :  { %v4145_v17 = vmul.f32 0.5, %v4142_v8  ;;  %v2686_v62 = vadd.f32 %v6466_v43, %v6226_v49  ;;  %v3722_v50 = vadd.f32 %v6466_v43, %v6418_v51 }
0x390d   :  { %v1135_v27 = vsub.f32 %v1132_v59, %v1132_v59  ;;  %v2171_v32 = vsub.f32 %v2168_v29, %v2168_v29  ;;  %v3207_v39 = vsub.f32 %v3204_v38, %v3204_v38  ;;  %v1653_v58 = vsub.f32 %v1650_v55, %v1650_v55 }
0x390e   :  { %v4146_v18 = vsel %vm5742_vm7, %v4142_v8, %v4145_v17  ;;  %v2689_v28 = vsub.f32 %v2686_v62, %v2686_v62  ;;  %v3725_v57 = vsub.f32 %v3722_v50, %v3722_v50 }
0x390f   :  { %5504 = vtanh.f32 %v4146_v18  ;;  %v1136_v31 = vmul.f32 1.442695, %v1135_v27  ;;  %v2172_v4 = vmul.f32 1.442695, %v2171_v32  ;;  %v3208_v5 = vmul.f32 1.442695, %v3207_v39 }
0x3910   :  { %v1654_v2 = vmul.f32 1.442695, %v1653_v58  ;;  %v2690_v54 = vmul.f32 1.442695, %v2689_v28  ;;  %v3726_v35 = vmul.f32 1.442695, %v3725_v57 }
0x3911   :  { %5506 = vpow2.f32 %v1136_v31 }
0x3912   :  { %5508 = vpow2.f32 %v2172_v4 }
0x3913   :  { %5510 = vpow2.f32 %v3208_v5 }
0x3919   :  { %v5505_v21 = vpop.eup %5504 }
0x391a   :  { %v4148_v23 = vmul.f32 0.5, %v5505_v21 }
0x391b   :  { %v5507_v11 = vpop.eup %5506 }
0x391c   :  { %v4149_v24 = vadd.f32 0.5, %v4148_v23  ;;  %5512 = vlog2.f32 %v5507_v11  ;;  %v5509_v42 = vpop.eup %5508 }
0x391d   :  { %v5511_v41 = vpop.eup %5510  ;;  %5514 = vlog2.f32 %v5509_v42 }
0x391e   :  { %v6460_v3 = vsel %vm5742_vm7, %v5505_v21, %v4149_v24  ;;  %5516 = vlog2.f32 %v5511_v41 }
0x391f   :  { %4153 = vrot.lane.b32.xlu0 %v6460_v3, %s5574_s25  ;;  %v4151_v30 = vmul.f32 %v6460_v3, %v6395_v36 }
0x3926   :  { %v5513_v44 = vpop.eup %5512 }
0x3927   :  { %v1140_v12 = vmul.f32 0.6931472, %v5513_v44  ;;  %v5515_v46 = vpop.eup %5514 }
0x3928   :  { %v5517_v14 = vpop.eup %5516  ;;  %v2176_v22 = vmul.f32 0.6931472, %v5515_v46 }
0x3929   :  { %v1141_v47 = vadd.f32 %v1140_v12, %v1132_v59  ;;  %v3212_v16 = vmul.f32 0.6931472, %v5517_v14 }
0x392a   :  { %v2177_v48 = vadd.f32 %v2176_v22, %v2168_v29 }
0x392b   :  { %v1142_v19 = vsub.f32 %v1132_v59, %v1141_v47  ;;  %v3213_v56 = vadd.f32 %v3212_v16, %v3204_v38 }
0x392c   :  { %v2178_v36 = vsub.f32 %v2168_v29, %v2177_v48 }
0x392d   :  { %v3214_v53 = vsub.f32 %v3204_v38, %v3213_v56  ;;  %v614_v38 = vadd.f32 %v6466_v43, %v5867_v45 }
0x392f   :  { %v617_v31 = vsub.f32 %v614_v38, %v614_v38 }
0x3931   :  { %v618_v32 = vmul.f32 1.442695, %v617_v31 }
0x3991   :  { %v4154_v25 = vpop.permute.xlu0 %4153 }
0x3992   :  { %v4156_v26 = vmul.f32 %v4154_v25, %v6460_v3 }
0x3994   :  { %4158 = vrot.lane.b32.xlu1 %v4156_v26, %s5575_s26 }
0x3a06   :  { %v4159_v6 = vpop.permute.xlu1 %4158 }
0x3a07   :  { %v4161_v7 = vadd.f32 %v4159_v6, %v4151_v30 }
0x3a09   :  { %5518 = vtanh.f32 %v4161_v7 }
0x3a0a   :  { %5520 = vpow2.f32 %v1654_v2 }
0x3a0b   :  { %5522 = vpow2.f32 %v2690_v54 }
0x3a0c   :  { %5524 = vpow2.f32 %v3726_v35 }
0x3a13   :  { %v5519_v20 = vpop.eup %5518 }
0x3a14   :  { %4164 = vrot.lane.b32.xlu0 %v5519_v20, %s5574_s25  ;;  %v5521_v9 = vpop.eup %5520  ;;  %s5580_s25 = smov 2  }
0x3a15   :  { %5526 = vlog2.f32 %v5521_v9  ;;  %v5523_v10 = vpop.eup %5522 }
0x3a16   :  { %5528 = vlog2.f32 %v5523_v10  ;;  %v5525_v52 = vpop.eup %5524 }
0x3a17   :  { %5530 = vlog2.f32 %v5525_v52 }
0x3a18   :  { %4252 = vrot.lane.b32.xlu0 %v1142_v19, %s5577_s0 }
0x3a1c   :  { %4260 = vrot.lane.b32.xlu0 %v2178_v36, %s5578_s18 }
0x3a1f   :  { %v5527_v37 = vpop.eup %5526 }
0x3a20   :  { %4268 = vrot.lane.b32.xlu0 %v3214_v53, %s5579_s29  ;;  %v1658_v15 = vmul.f32 0.6931472, %v5527_v37  ;;  %v5529_v49 = vpop.eup %5528 }
0x3a21   :  { %v2694_v0 = vmul.f32 0.6931472, %v5529_v49  ;;  %v5531_v1 = vpop.eup %5530 }
0x3a22   :  { %v1659_v63 = vadd.f32 %v1658_v15, %v1650_v55  ;;  %v3730_v34 = vmul.f32 0.6931472, %v5531_v1 }
0x3a23   :  { %v2695_v40 = vadd.f32 %v2694_v0, %v2686_v62 }
0x3a24   :  { %v1660_v33 = vsub.f32 %v1650_v55, %v1659_v63  ;;  %v3731_v60 = vadd.f32 %v3730_v34, %v3722_v50 }
0x3a25   :  { %v2696_v8 = vsub.f32 %v2686_v62, %v2695_v40 }
0x3a26   :  { %v3732_v13 = vsub.f32 %v3722_v50, %v3731_v60 }
0x3a86   :  { %v4165_v61 = vpop.permute.xlu0 %4164 }
0x3a87   :  { %v4167_v51 = vmul.f32 %v4165_v61, %v6460_v3 }
0x3a89   :  { %4169 = vrot.lane.b32.xlu1 %v4167_v51, %s5575_s26  ;;  %s5583_s26 = smov 7  }
0x3a8a   :  { %v4253_v11 = vpop.permute.xlu0 %4252 }
0x3a8d   :  { %4256 = vrot.lane.b32.xlu1 %v1660_v33, %s5580_s25 }
0x3a8e   :  { %v4261_v6 = vpop.permute.xlu0 %4260 }
0x3a91   :  { %4264 = vrot.lane.b32.xlu1 %v2696_v8, %s5581_s30 }
0x3a92   :  { %v4269_v45 = vpop.permute.xlu0 %4268 }
0x3a95   :  { %4272 = vrot.lane.b32.xlu1 %v3732_v13, %s5582_s3 }
0x3afb   :  { %v4170_v17 = vpop.permute.xlu1 %4169 }
0x3afc   :  { %5156 = vmatmul.mubr.msk.f32.vlgmr.msra.gmra.mrb[46].mxu0 %vm431_vm8, %v4170_v17 }
0x3aff   :  { %v4257_v41 = vpop.permute.xlu1 %4256 }
0x3b03   :  { %v4265_v44 = vpop.permute.xlu1 %4264 }
0x3b07   :  { %v4273_v14 = vpop.permute.xlu1 %4272 }
0x3bcf   :  { %v4239_v18 = vpop.f32.mrb[46].mxu0 }
0x3bd0   :  { %v4240_v21 = vadd.f32 %v6466_v43, %v4239_v18  ;;  %v5157_v23 = vpop.f32.mrb[47].mxu0 }
0x3bd2   :  { %v4243_v24 = vsub.f32 %v4240_v21, %v4240_v21 }
0x3bd4   :  { %v4244_v3 = vmul.f32 1.442695, %v4243_v24 }
0x3bd6   :  { %5532 = vpow2.f32 %v4244_v3 }
0x3be0   :  { %v5533_v25 = vpop.eup %5532 }
0x3be1   :  { %5534 = vlog2.f32 %v5533_v25 }
0x3be2   :  { %5536 = vpow2.f32 %v618_v32 }
0x3beb   :  { %v5535_v26 = vpop.eup %5534 }
0x3bec   :  { %v4248_v59 = vmul.f32 0.6931472, %v5535_v26  ;;  %v5537_v39 = vpop.eup %5536 }
0x3bed   :  { %5538 = vlog2.f32 %v5537_v39 }
0x3bee   :  { %v4249_v27 = vadd.f32 %v4248_v59, %v4240_v21 }
0x3bf0   :  { %v4250_v29 = vsub.f32 %v4240_v21, %v4249_v27 }
0x3bf2   :  { %4276 = vrot.lane.b32.xlu0 %v4250_v29, %s5583_s26 }
0x3bf7   :  { %v5539_v4 = vpop.eup %5538 }
0x3bf8   :  { %v622_v5 = vmul.f32 0.6931472, %v5539_v4 }
0x3bfa   :  { %v623_v42 = vadd.f32 %v622_v5, %v614_v38 }
0x3bfc   :  { %v624_v30 = vsub.f32 %v614_v38, %v623_v42 }
0x3bfe   :  { %v4280_v7 = vsel %vm4279_vm10, %v624_v30, %v4253_v11 }
0x3bff   :  { %v4282_v12 = vsel %vm4281_vm11, %v4280_v7, %v4257_v41 }
0x3c00   :  { %v4284_v46 = vsel %vm4283_vm12, %v4282_v12, %v4261_v6 }
0x3c01   :  { %v4285_v43 = vsel %vm162_vm2, %v4284_v46, %v4265_v44 }
0x3c02   :  { %v4287_v47 = vsel %vm4286_vm13, %v4285_v43, %v4269_v45 }
0x3c03   :  { %v4289_v22 = vsel %vm4288_vm14, %v4287_v47, %v4273_v14 }
0x3c64   :  { %v4277_v20 = vpop.permute.xlu0 %4276 }
0x3c65   :  { %v4291_v48 = vsel %vm4290_vm15, %v4289_v22, %v4277_v20 }
0x3c66   :  { %4293 = vst.msk [vmem:[#allocation3] sm:$0x3] %vm4292_vm0, %v4291_v48 }
0x3c67   :  { %5558 = shalt.err (!%p5555_p4)
}
0x3c68   :  { %s5559_s17 = scalar_lea.hbm %s6513_s11, 32 }
0x3c69   :  { %p5560_p5 = scmp.ne.s32.totalorder %s6513_s11, %s5559_s17  ;;  %p5563_p6 = scmp.lt.u32.totalorder %s5559_s17, %s6513_s11 }
0x3c6b   :  { %p5565_p7 = pnand %p5563_p6, %p5560_p5 }
0x3c6d   :  { %5568 = shalt.err (!%p5565_p7)
}
0x3c6e   :  { %4303 = dma.vmem_to_hbm [thread:$0]  %s4301_s13, 32, %s6513_s11, [#allocation4]  }
0x3c6f   :  { %5569 = dma.done.wait [#allocation4], 32  }
0x3c70   :  { %5570 = vsyncadd [#allocation4], 4294967264 }
0x3c71   :  { %4307 = vsyncpa [#allocation4], 1 }

</bundles_post_ra>
